<compile_context>
chip_gen: v7x
topology: tpu7x:2x2x1
jax: 0.10.0
libtpu: 0.0.40
codegen_flags: <defaults>
</compile_context>

<pallas_src>
import functools

import jax
import jax.numpy as jnp
from jax.experimental import pallas as pl
from jax.experimental.pallas import tpu as pltpu

K = 3  # kernel_size used by the module (stride=2, padding=1, output_padding=1)

# For output parity p (even/odd) and input tap offset t in {0,1}: which kernel index
# contributes.  Derived from  out = 2*in - 1 + k  (stride=2, pad=1, k in 0..2):
#   p=0 (even): t=0 -> k=1            (t=1 contributes nothing)
#   p=1 (odd) : t=0 -> k=2, t=1 -> k=0
_KIDX = {(0, 0): 1, (1, 0): 2, (1, 1): 0}


def _deconv_bn_relu_kernel(xa_ref, xb_ref, w_ref, s_ref, o_ref):
    """One (batch, d-tile) grid step.

    xa_ref: (1, bd, H+1, W+1, Cin)   input rows d      (d-tap offset 0)
    xb_ref: (1, bd, H+1, W+1, Cin)   input rows d + 1  (d-tap offset 1)
    w_ref : (8*Cin, 8*Cout)          packed polyphase weights (BN scale folded in)
    s_ref : (1, 8*Cout)              folded conv-bias + BN shift
    o_ref : (1, bd*H*W, 8*Cout)      packed output (parity-major channels) — lane dense
    """
    bd, Hp, Wp, Cin = xa_ref.shape[1], xa_ref.shape[2], xa_ref.shape[3], xa_ref.shape[4]
    H, W = Hp - 1, Wp - 1
    C8 = o_ref.shape[-1]
    P = bd * H * W

    acc = jnp.zeros((P, C8), jnp.float32)
    for td in range(2):
        src = xa_ref if td == 0 else xb_ref
        for th in range(2):
            for tw in range(2):
                tap = (td * 2 + th) * 2 + tw
                slab = src[0, :, th:th + H, tw:tw + W, :]          # (bd, H, W, Cin)
                slab = slab.reshape(P, Cin)
                acc = acc + jnp.dot(slab, w_ref[tap * Cin:(tap + 1) * Cin, :],
                                    preferred_element_type=jnp.float32)

    y = jnp.maximum(acc + s_ref[0], 0.0)                            # bias/BN shift + ReLU
    o_ref[0] = y.astype(o_ref.dtype)


def _build_packed_weights(weight, bias, gamma, beta, run_mean, run_var, eps=1e-5):
    """Packed polyphase weights (8*Cin, 8*Cout) with BN scale folded in, plus shift (8*Cout,)."""
    Cin, Cout = weight.shape[0], weight.shape[1]
    inv_std_g = (gamma / jnp.sqrt(run_var + eps)).astype(jnp.float32)          # (Cout,)
    shift = ((bias - run_mean) * inv_std_g + beta).astype(jnp.float32)         # (Cout,)

    wc = jnp.zeros((8 * Cin, 8 * Cout), jnp.float32)
    w32 = weight.astype(jnp.float32)
    for td in range(2):
        for th in range(2):
            for tw in range(2):
                tap = (td * 2 + th) * 2 + tw
                for pd in range(2):
                    for ph in range(2):
                        for pw in range(2):
                            if ((pd, td) not in _KIDX or (ph, th) not in _KIDX
                                    or (pw, tw) not in _KIDX):
                                continue
                            kd, kh, kw = _KIDX[(pd, td)], _KIDX[(ph, th)], _KIDX[(pw, tw)]
                            p = (pd * 2 + ph) * 2 + pw
                            blk = w32[:, :, kd, kh, kw] * inv_std_g[None, :]   # (Cin, Cout)
                            wc = wc.at[tap * Cin:(tap + 1) * Cin,
                                       p * Cout:(p + 1) * Cout].set(blk)
    shift8 = jnp.tile(shift, 8)                                                 # (8*Cout,)
    return wc, shift8


def _pick_block_d(n, d, h, w, c8, out_tile_budget_bytes=1 << 20):
    """Largest d-tile whose output tile fits the budget (keeps VMEM bounded on v7x/v5e)."""
    cands = [t for t in range(1, d + 1)
             if d % t == 0 and (t == d or (t * h * w) % 8 == 0)]
    fitting = [t for t in cands if t * h * w * c8 * 4 <= out_tile_budget_bytes]
    bd = max(fitting) if fitting else min(cands)
    if n == 1 and bd == d:                      # feed both v7x TensorCores at batch 1
        smaller = [t for t in fitting if t < d]
        if smaller:
            bd = max(smaller)
    return bd


@functools.partial(jax.jit, static_argnames=("block_d",))
def lesion_gate_deconv(x_ncdhw, weight, bias, gamma, beta, run_mean, run_var, *, block_d=None):
    """x_ncdhw: (N, Cin, D, H, W); weight: (Cin, Cout, 3, 3, 3) [PyTorch ConvTranspose3d]."""
    N, Cin, D, H, W = x_ncdhw.shape
    Cout = weight.shape[1]
    C8 = 8 * Cout

    # ---- glue: channels-last + end-pad by 1 (handles the odd-parity boundary tap) ----
    x = jnp.transpose(x_ncdhw, (0, 2, 3, 4, 1)).astype(jnp.float32)            # NDHWC
    xp = jnp.pad(x, ((0, 0), (0, 1), (0, 1), (0, 1), (0, 0)))                  # (N,D+1,H+1,W+1,Cin)
    xa = xp[:, :D]          # d-tap offset 0
    xb = xp[:, 1:D + 1]     # d-tap offset 1  (avoids overlapping/halo'd input blocks)

    wc, shift8 = _build_packed_weights(weight, bias, gamma, beta, run_mean, run_var)
    shift8 = shift8.reshape(1, C8)

    if block_d is None:
        block_d = _pick_block_d(N, D, H, W, C8)
    assert D % block_d == 0
    n_dt = D // block_d
    p_blk = block_d * H * W

    out = pl.pallas_call(
        _deconv_bn_relu_kernel,
        out_shape=jax.ShapeDtypeStruct((N, D * H * W, C8), jnp.float32),
        grid=(N, n_dt),
        in_specs=[
            pl.BlockSpec((1, block_d, H + 1, W + 1, Cin), lambda n, i: (n, i, 0, 0, 0)),
            pl.BlockSpec((1, block_d, H + 1, W + 1, Cin), lambda n, i: (n, i, 0, 0, 0)),
            pl.BlockSpec((8 * Cin, C8), lambda n, i: (0, 0)),
            pl.BlockSpec((1, C8), lambda n, i: (0, 0)),
        ],
        out_specs=pl.BlockSpec((1, p_blk, C8), lambda n, i: (n, i, 0)),
        compiler_params=pltpu.CompilerParams(
            dimension_semantics=("parallel", "parallel")),
    )(xa, xb, wc, shift8)

    # depth-to-space: packed (pd, ph, pw, co) channels -> full-resolution volume, then NCDHW.
    y = out.reshape(N, D, H, W, 2, 2, 2, Cout)
    y = jnp.transpose(y, (0, 1, 4, 2, 5, 3, 6, 7)).reshape(N, 2 * D, 2 * H, 2 * W, Cout)
    return jnp.transpose(y, (0, 4, 1, 2, 3))


def _reference(x_ncdhw, weight, bias, gamma, beta, run_mean, run_var):
    """Pure-XLA reference (dilated-input formulation) for a correctness check."""
    eps = 1e-5
    N, Cin, D, H, W = x_ncdhw.shape
    x = jnp.transpose(x_ncdhw, (0, 2, 3, 4, 1))
    x_up = jnp.zeros((N, 2 * D - 1, 2 * H - 1, 2 * W - 1, Cin), x.dtype)
    x_up = x_up.at[:, ::2, ::2, ::2, :].set(x)
    x_pad = jnp.pad(x_up, ((0, 0), (1, 2), (1, 2), (1, 2), (0, 0)))
    w_flip = jnp.transpose(jnp.flip(weight, axis=(2, 3, 4)), (2, 3, 4, 0, 1))   # DHWIO
    conv = jax.lax.conv_general_dilated(
        x_pad, w_flip, window_strides=(1, 1, 1), padding="VALID",
        dimension_numbers=("NDHWC", "DHWIO", "NDHWC"))
    inv_std = 1.0 / jnp.sqrt(run_var + eps)
    y = (conv + bias - run_mean) * (gamma * inv_std) + beta
    y = jnp.maximum(y, 0.0)
    return jnp.transpose(y, (0, 4, 1, 2, 3))


if __name__ == "__main__":
    key = jax.random.PRNGKey(0)
    # 8*Cout == 128 -> exactly lane-dense packed output channels.
    N, Cin, Cout, D, H, W = 2, 4, 16, 8, 8, 8

    k_x, k_w, k_b, k_g, k_be, k_m, k_v = jax.random.split(key, 7)
    x = jax.random.normal(k_x, (N, Cin, D, H, W), jnp.float32)
    weight = 0.1 * jax.random.normal(k_w, (Cin, Cout, K, K, K), jnp.float32)
    bias = 0.1 * jax.random.normal(k_b, (Cout,), jnp.float32)
    gamma = 1.0 + 0.1 * jax.random.normal(k_g, (Cout,), jnp.float32)
    beta = 0.1 * jax.random.normal(k_be, (Cout,), jnp.float32)
    run_mean = 0.1 * jax.random.normal(k_m, (Cout,), jnp.float32)
    run_var = jnp.abs(jax.random.normal(k_v, (Cout,), jnp.float32)) + 0.5

    ref = _reference(x, weight, bias, gamma, beta, run_mean, run_var)

    out = lesion_gate_deconv(x, weight, bias, gamma, beta, run_mean, run_var)
    out = jax.block_until_ready(out)
    assert out.shape == (N, Cout, 2 * D, 2 * H, 2 * W), out.shape
    assert jnp.allclose(out, ref, atol=1e-4, rtol=1e-4), float(jnp.max(jnp.abs(out - ref)))

    # also exercise the d-tiled path (grid = (N, D/block_d) with 2 d-tiles)
    out_t = lesion_gate_deconv(x, weight, bias, gamma, beta, run_mean, run_var, block_d=4)
    out_t = jax.block_until_ready(out_t)
    assert jnp.allclose(out_t, ref, atol=1e-4, rtol=1e-4), float(jnp.max(jnp.abs(out_t - ref)))

    print("KERNEL_OK")
</pallas_src>

<mosaic_0001>
module attributes {stable_mosaic.version = 11 : i64} {
  func.func @_deconv_bn_relu_kernel(%arg0: i32, %arg1: i32, %arg2: memref<1x8x9x9x4xf32, #tpu.memory_space<vmem>>, %arg3: memref<1x8x9x9x4xf32, #tpu.memory_space<vmem>>, %arg4: memref<32x128xf32, #tpu.memory_space<vmem>>, %arg5: memref<1x128xf32, #tpu.memory_space<vmem>>, %arg6: memref<1x512x128xf32, #tpu.memory_space<vmem>>) attributes {dimension_semantics = [#tpu.dimension_semantics<parallel>, #tpu.dimension_semantics<parallel>], iteration_bounds = array<i64: 2, 1>, scalar_prefetch = 0 : i64, scratch_operands = 0 : i64, tpu.core_type = #tpu.core_type<tc>, window_params = [{transform_indices = @transform_0, window_bounds = array<i64: 1, 8, 9, 9, 4>}, {transform_indices = @transform_1, window_bounds = array<i64: 1, 8, 9, 9, 4>}, {pipeline_mode = #tpu.pipeline_mode<synchronous>, transform_indices = @transform_2, window_bounds = array<i64: 32, 128>}, {pipeline_mode = #tpu.pipeline_mode<synchronous>, transform_indices = @transform_3, window_bounds = array<i64: 1, 128>}, {transform_indices = @transform_4, window_bounds = array<i64: 1, 512, 128>}]} {
    %cst = arith.constant 0.000000e+00 : f32
    %0 = vector.broadcast %cst : f32 to vector<512x128xf32>
    %c0 = arith.constant 0 : index
    %c0_0 = arith.constant 0 : index
    %c0_1 = arith.constant 0 : index
    %c0_2 = arith.constant 0 : index
    %c0_3 = arith.constant 0 : index
    %1 = vector.load %arg2[%c0, %c0_0, %c0_1, %c0_2, %c0_3] : memref<1x8x9x9x4xf32, #tpu.memory_space<vmem>>, vector<1x8x8x8x4xf32>
    %2 = vector.shape_cast %1 : vector<1x8x8x8x4xf32> to vector<8x8x8x4xf32>
    %3 = vector.shape_cast %2 : vector<8x8x8x4xf32> to vector<512x4xf32>
    %c0_4 = arith.constant 0 : index
    %c0_5 = arith.constant 0 : index
    %4 = vector.load %arg4[%c0_4, %c0_5] : memref<32x128xf32, #tpu.memory_space<vmem>>, vector<4x128xf32>
    %cst_6 = arith.constant dense<0.000000e+00> : vector<512x128xf32>
    %5 = tpu.matmul %3, %4, %cst_6 {dimension_numbers = #tpu.dot_dimension_numbers<[1], [0], [0], [1], [0, 0, 1, 1], [], []>} : vector<512x4xf32>, vector<4x128xf32>, vector<512x128xf32> -> vector<512x128xf32>
    %6 = arith.addf %0, %5 : vector<512x128xf32>
    %c0_7 = arith.constant 0 : index
    %c0_8 = arith.constant 0 : index
    %c0_9 = arith.constant 0 : index
    %c1 = arith.constant 1 : index
    %c0_10 = arith.constant 0 : index
    %7 = vector.load %arg2[%c0_7, %c0_8, %c0_9, %c1, %c0_10] : memref<1x8x9x9x4xf32, #tpu.memory_space<vmem>>, vector<1x8x8x8x4xf32>
    %8 = vector.shape_cast %7 : vector<1x8x8x8x4xf32> to vector<8x8x8x4xf32>
    %9 = vector.shape_cast %8 : vector<8x8x8x4xf32> to vector<512x4xf32>
    %c4 = arith.constant 4 : index
    %c0_11 = arith.constant 0 : index
    %10 = vector.load %arg4[%c4, %c0_11] : memref<32x128xf32, #tpu.memory_space<vmem>>, vector<4x128xf32>
    %cst_12 = arith.constant dense<0.000000e+00> : vector<512x128xf32>
    %11 = tpu.matmul %9, %10, %cst_12 {dimension_numbers = #tpu.dot_dimension_numbers<[1], [0], [0], [1], [0, 0, 1, 1], [], []>} : vector<512x4xf32>, vector<4x128xf32>, vector<512x128xf32> -> vector<512x128xf32>
    %12 = arith.addf %6, %11 : vector<512x128xf32>
    %c0_13 = arith.constant 0 : index
    %c0_14 = arith.constant 0 : index
    %c1_15 = arith.constant 1 : index
    %c0_16 = arith.constant 0 : index
    %c0_17 = arith.constant 0 : index
    %13 = vector.load %arg2[%c0_13, %c0_14, %c1_15, %c0_16, %c0_17] : memref<1x8x9x9x4xf32, #tpu.memory_space<vmem>>, vector<1x8x8x8x4xf32>
    %14 = vector.shape_cast %13 : vector<1x8x8x8x4xf32> to vector<8x8x8x4xf32>
    %15 = vector.shape_cast %14 : vector<8x8x8x4xf32> to vector<512x4xf32>
    %c8 = arith.constant 8 : index
    %c0_18 = arith.constant 0 : index
    %16 = vector.load %arg4[%c8, %c0_18] : memref<32x128xf32, #tpu.memory_space<vmem>>, vector<4x128xf32>
    %cst_19 = arith.constant dense<0.000000e+00> : vector<512x128xf32>
    %17 = tpu.matmul %15, %16, %cst_19 {dimension_numbers = #tpu.dot_dimension_numbers<[1], [0], [0], [1], [0, 0, 1, 1], [], []>} : vector<512x4xf32>, vector<4x128xf32>, vector<512x128xf32> -> vector<512x128xf32>
    %18 = arith.addf %12, %17 : vector<512x128xf32>
    %c0_20 = arith.constant 0 : index
    %c0_21 = arith.constant 0 : index
    %c1_22 = arith.constant 1 : index
    %c1_23 = arith.constant 1 : index
    %c0_24 = arith.constant 0 : index
    %19 = vector.load %arg2[%c0_20, %c0_21, %c1_22, %c1_23, %c0_24] : memref<1x8x9x9x4xf32, #tpu.memory_space<vmem>>, vector<1x8x8x8x4xf32>
    %20 = vector.shape_cast %19 : vector<1x8x8x8x4xf32> to vector<8x8x8x4xf32>
    %21 = vector.shape_cast %20 : vector<8x8x8x4xf32> to vector<512x4xf32>
    %c12 = arith.constant 12 : index
    %c0_25 = arith.constant 0 : index
    %22 = vector.load %arg4[%c12, %c0_25] : memref<32x128xf32, #tpu.memory_space<vmem>>, vector<4x128xf32>
    %cst_26 = arith.constant dense<0.000000e+00> : vector<512x128xf32>
    %23 = tpu.matmul %21, %22, %cst_26 {dimension_numbers = #tpu.dot_dimension_numbers<[1], [0], [0], [1], [0, 0, 1, 1], [], []>} : vector<512x4xf32>, vector<4x128xf32>, vector<512x128xf32> -> vector<512x128xf32>
    %24 = arith.addf %18, %23 : vector<512x128xf32>
    %c0_27 = arith.constant 0 : index
    %c0_28 = arith.constant 0 : index
    %c0_29 = arith.constant 0 : index
    %c0_30 = arith.constant 0 : index
    %c0_31 = arith.constant 0 : index
    %25 = vector.load %arg3[%c0_27, %c0_28, %c0_29, %c0_30, %c0_31] : memref<1x8x9x9x4xf32, #tpu.memory_space<vmem>>, vector<1x8x8x8x4xf32>
    %26 = vector.shape_cast %25 : vector<1x8x8x8x4xf32> to vector<8x8x8x4xf32>
    %27 = vector.shape_cast %26 : vector<8x8x8x4xf32> to vector<512x4xf32>
    %c16 = arith.constant 16 : index
    %c0_32 = arith.constant 0 : index
    %28 = vector.load %arg4[%c16, %c0_32] : memref<32x128xf32, #tpu.memory_space<vmem>>, vector<4x128xf32>
    %cst_33 = arith.constant dense<0.000000e+00> : vector<512x128xf32>
    %29 = tpu.matmul %27, %28, %cst_33 {dimension_numbers = #tpu.dot_dimension_numbers<[1], [0], [0], [1], [0, 0, 1, 1], [], []>} : vector<512x4xf32>, vector<4x128xf32>, vector<512x128xf32> -> vector<512x128xf32>
    %30 = arith.addf %24, %29 : vector<512x128xf32>
    %c0_34 = arith.constant 0 : index
    %c0_35 = arith.constant 0 : index
    %c0_36 = arith.constant 0 : index
    %c1_37 = arith.constant 1 : index
    %c0_38 = arith.constant 0 : index
    %31 = vector.load %arg3[%c0_34, %c0_35, %c0_36, %c1_37, %c0_38] : memref<1x8x9x9x4xf32, #tpu.memory_space<vmem>>, vector<1x8x8x8x4xf32>
    %32 = vector.shape_cast %31 : vector<1x8x8x8x4xf32> to vector<8x8x8x4xf32>
    %33 = vector.shape_cast %32 : vector<8x8x8x4xf32> to vector<512x4xf32>
    %c20 = arith.constant 20 : index
    %c0_39 = arith.constant 0 : index
    %34 = vector.load %arg4[%c20, %c0_39] : memref<32x128xf32, #tpu.memory_space<vmem>>, vector<4x128xf32>
    %cst_40 = arith.constant dense<0.000000e+00> : vector<512x128xf32>
    %35 = tpu.matmul %33, %34, %cst_40 {dimension_numbers = #tpu.dot_dimension_numbers<[1], [0], [0], [1], [0, 0, 1, 1], [], []>} : vector<512x4xf32>, vector<4x128xf32>, vector<512x128xf32> -> vector<512x128xf32>
    %36 = arith.addf %30, %35 : vector<512x128xf32>
    %c0_41 = arith.constant 0 : index
    %c0_42 = arith.constant 0 : index
    %c1_43 = arith.constant 1 : index
    %c0_44 = arith.constant 0 : index
    %c0_45 = arith.constant 0 : index
    %37 = vector.load %arg3[%c0_41, %c0_42, %c1_43, %c0_44, %c0_45] : memref<1x8x9x9x4xf32, #tpu.memory_space<vmem>>, vector<1x8x8x8x4xf32>
    %38 = vector.shape_cast %37 : vector<1x8x8x8x4xf32> to vector<8x8x8x4xf32>
    %39 = vector.shape_cast %38 : vector<8x8x8x4xf32> to vector<512x4xf32>
    %c24 = arith.constant 24 : index
    %c0_46 = arith.constant 0 : index
    %40 = vector.load %arg4[%c24, %c0_46] : memref<32x128xf32, #tpu.memory_space<vmem>>, vector<4x128xf32>
    %cst_47 = arith.constant dense<0.000000e+00> : vector<512x128xf32>
    %41 = tpu.matmul %39, %40, %cst_47 {dimension_numbers = #tpu.dot_dimension_numbers<[1], [0], [0], [1], [0, 0, 1, 1], [], []>} : vector<512x4xf32>, vector<4x128xf32>, vector<512x128xf32> -> vector<512x128xf32>
    %42 = arith.addf %36, %41 : vector<512x128xf32>
    %c0_48 = arith.constant 0 : index
    %c0_49 = arith.constant 0 : index
    %c1_50 = arith.constant 1 : index
    %c1_51 = arith.constant 1 : index
    %c0_52 = arith.constant 0 : index
    %43 = vector.load %arg3[%c0_48, %c0_49, %c1_50, %c1_51, %c0_52] : memref<1x8x9x9x4xf32, #tpu.memory_space<vmem>>, vector<1x8x8x8x4xf32>
    %44 = vector.shape_cast %43 : vector<1x8x8x8x4xf32> to vector<8x8x8x4xf32>
    %45 = vector.shape_cast %44 : vector<8x8x8x4xf32> to vector<512x4xf32>
    %c28 = arith.constant 28 : index
    %c0_53 = arith.constant 0 : index
    %46 = vector.load %arg4[%c28, %c0_53] : memref<32x128xf32, #tpu.memory_space<vmem>>, vector<4x128xf32>
    %cst_54 = arith.constant dense<0.000000e+00> : vector<512x128xf32>
    %47 = tpu.matmul %45, %46, %cst_54 {dimension_numbers = #tpu.dot_dimension_numbers<[1], [0], [0], [1], [0, 0, 1, 1], [], []>} : vector<512x4xf32>, vector<4x128xf32>, vector<512x128xf32> -> vector<512x128xf32>
    %48 = arith.addf %42, %47 : vector<512x128xf32>
    %c0_55 = arith.constant 0 : index
    %c0_56 = arith.constant 0 : index
    %49 = vector.load %arg5[%c0_55, %c0_56] : memref<1x128xf32, #tpu.memory_space<vmem>>, vector<1x128xf32>
    %50 = vector.shape_cast %49 : vector<1x128xf32> to vector<128xf32>
    %51 = vector.shape_cast %50 : vector<128xf32> to vector<1x128xf32>
    %52 = vector.broadcast %51 : vector<1x128xf32> to vector<512x128xf32>
    %53 = arith.addf %48, %52 : vector<512x128xf32>
    %cst_57 = arith.constant 0.000000e+00 : f32
    %54 = vector.broadcast %cst_57 : f32 to vector<512x128xf32>
    %55 = arith.maximumf %53, %54 : vector<512x128xf32>
    %c0_58 = arith.constant 0 : index
    %c0_59 = arith.constant 0 : index
    %c0_60 = arith.constant 0 : index
    %56 = vector.load %arg6[%c0_58, %c0_59, %c0_60] : memref<1x512x128xf32, #tpu.memory_space<vmem>>, vector<1x512x128xf32>
    %57 = vector.shape_cast %56 : vector<1x512x128xf32> to vector<512x128xf32>
    %58 = vector.shape_cast %55 : vector<512x128xf32> to vector<1x512x128xf32>
    tpu.vector_store %arg6[%c0_58, %c0_59, %c0_60], %58 {strides = array<i32>} : memref<1x512x128xf32, #tpu.memory_space<vmem>>, vector<1x512x128xf32>,
    return
  }
  func.func @transform_0(%arg0: i32, %arg1: i32) -> (i32, i32, i32, i32, i32) {
    %c0_i32 = arith.constant 0 : i32
    %c0_i32_0 = arith.constant 0 : i32
    %c0_i32_1 = arith.constant 0 : i32
    %c0_i32_2 = arith.constant 0 : i32
    return %arg0, %arg1, %c0_i32, %c0_i32_0, %c0_i32_1 : i32, i32, i32, i32, i32
  }
  func.func @transform_1(%arg0: i32, %arg1: i32) -> (i32, i32, i32, i32, i32) {
    %c0_i32 = arith.constant 0 : i32
    %c0_i32_0 = arith.constant 0 : i32
    %c0_i32_1 = arith.constant 0 : i32
    %c0_i32_2 = arith.constant 0 : i32
    return %arg0, %arg1, %c0_i32, %c0_i32_0, %c0_i32_1 : i32, i32, i32, i32, i32
  }
  func.func @transform_2(%arg0: i32, %arg1: i32) -> (i32, i32) {
    %c0_i32 = arith.constant 0 : i32
    %c0_i32_0 = arith.constant 0 : i32
    %c0_i32_1 = arith.constant 0 : i32
    return %c0_i32, %c0_i32_0 : i32, i32
  }
  func.func @transform_3(%arg0: i32, %arg1: i32) -> (i32, i32) {
    %c0_i32 = arith.constant 0 : i32
    %c0_i32_0 = arith.constant 0 : i32
    %c0_i32_1 = arith.constant 0 : i32
    return %c0_i32, %c0_i32_0 : i32, i32
  }
  func.func @transform_4(%arg0: i32, %arg1: i32) -> (i32, i32, i32) {
    %c0_i32 = arith.constant 0 : i32
    %c0_i32_0 = arith.constant 0 : i32
    return %arg0, %arg1, %c0_i32 : i32, i32, i32
  }
}

</mosaic_0001>

<bundles_post_ra>
// kernel: tile.8
= control target key start
LH: loop header
LB: loop body
LE: loop exit
PB: predicated region body
PF: predicated region fallthrough
CT: control target
= control target key end

     0   :  { %s22_s0 = inlined_call_operand.vmem [shape: f32[16], index: 0, kind: input, shape index: {}]   ;;  %s23_s1 = inlined_call_operand.vmem [shape: f32[8,16], index: 1, kind: output, shape index: {}]  }
   0x1   :  { %v4_v0 = vld [vmem:[%s22_s0] ss:$0 sm:$0xff] }
   0x2   :  { %5 = vst [vmem:[%s23_s1] sm:$0xff] %v4_v0 }

// kernel: tile.9
= control target key start
LH: loop header
LB: loop body
LE: loop exit
PB: predicated region body
PF: predicated region fallthrough
CT: control target
= control target key end

     0   :  { %s67_s10 = smov 112   ;;  %s68_s11 = smov 80   ;;  %vm3_vm0 = vcmask 130048   ;;  %vm9_vm1 = vcmask 1048448   ;;  %vm15_vm2 = vcmask 917248   ;;  %vm21_vm3 = vcmask 786048   ;;  %s111_s0 = inlined_call_operand.vmem [shape: f32[8,16], index: 0, kind: input, shape index: {}]   ;;  %s112_s1 = inlined_call_operand.vmem [shape: f32[1,128], index: 1, kind: output, shape index: {}]  }
   0x1   :  { %v53_v0 = vld [vmem:[%s111_s0 + $0x7] sm:$0x1]   ;;  %v55_v1 = vld [vmem:[%s111_s0 + $0x5] sm:$0x1]   ;;  %v54_v2 = vld [vmem:[%s111_s0 + $0x6] sm:$0x1]  }
   0x2   :  { %7 = vrot.lane.b32.xlu0 %v53_v0, %s67_s10  ;;  %19 = vrot.lane.b32.xlu1 %v55_v1, %s68_s11  ;;  %v56_v3 = vld [vmem:[%s111_s0 + $0x4] sm:$0x1]   ;;  %v2_v4 = vld [vmem:[%s111_s0] sm:$0x1]   ;;  %s69_s18 = smov 96   ;;  %s70_s19 = smov 64  }
   0x3   :  { %4 = vst.msk [vmem:[#allocation0] sm:$0x1] %vm3_vm0, %v2_v4   ;;  %v57_v5 = vld [vmem:[%s111_s0 + $0x3] sm:$0x1]   ;;  %v58_v6 = vld [vmem:[%s111_s0 + $0x2] sm:$0x1]  }
   0x4   :  { %s71_s24 = smov 48   ;;  %s72_s25 = smov 32   ;;  %v59_v7 = vld [vmem:[%s111_s0 + $0x1] sm:$0x1]   ;;  %vm27_vm4 = vcmask 654848   ;;  %vm33_vm5 = vcmask 523648  }
   0x5   :  { %s73_s0 = smov 16   ;;  %vm39_vm6 = vcmask 392448   ;;  %vm45_vm7 = vcmask 261248  }
   0x6   :  { %13 = vrot.lane.b32.xlu0 %v54_v2, %s69_s18  ;;  %25 = vrot.lane.b32.xlu1 %v56_v3, %s70_s19 }
   0xa   :  { %31 = vrot.lane.b32.xlu0 %v57_v5, %s71_s24  ;;  %37 = vrot.lane.b32.xlu1 %v58_v6, %s72_s25 }
   0xe   :  { %43 = vrot.lane.b32.xlu0 %v59_v7, %s73_s0 }
  0x74   :  { %v8_v8 = vpop.permute.xlu0 %7   ;;  %v20_v9 = vpop.permute.xlu1 %19  }
  0x75   :  { %10 = vst.msk [vmem:[#allocation0] sm:$0x1] %vm9_vm1, %v8_v8  }
  0x78   :  { %v14_v10 = vpop.permute.xlu0 %13   ;;  %v26_v11 = vpop.permute.xlu1 %25  }
  0x79   :  { %16 = vst.msk [vmem:[#allocation0] sm:$0x1] %vm15_vm2, %v14_v10  }
  0x7a   :  { %22 = vst.msk [vmem:[#allocation0] sm:$0x1] %vm21_vm3, %v20_v9  }
  0x7b   :  { %28 = vst.msk [vmem:[#allocation0] sm:$0x1] %vm27_vm4, %v26_v11  }
  0x7c   :  { %v32_v12 = vpop.permute.xlu0 %31   ;;  %v38_v13 = vpop.permute.xlu1 %37  }
  0x7d   :  { %34 = vst.msk [vmem:[#allocation0] sm:$0x1] %vm33_vm5, %v32_v12  }
  0x7e   :  { %40 = vst.msk [vmem:[#allocation0] sm:$0x1] %vm39_vm6, %v38_v13  }
  0x80   :  { %v44_v14 = vpop.permute.xlu0 %43  }
  0x81   :  { %46 = vst.msk [vmem:[#allocation0] sm:$0x1] %vm45_vm7, %v44_v14  }
  0x88   :  { %v50_v15 = vld [vmem:[#allocation0] sm:$0x1] }
  0x89   :  { %52 = vst [vmem:[%s112_s1] sm:$0x1] %v50_v15 }

// kernel: lesion_gate_deconv.1
= control target key start
LH: loop header
LB: loop body
LE: loop exit
PB: predicated region body
PF: predicated region fallthrough
CT: control target
= control target key end

     0   :  { %s8752_s15 = smov 0   ;;  %s8754_s16 = smov 0   ;;  %s10179_s0 = inlined_call_operand.vmem [shape: f32[2,8,9,9,4], index: 0, kind: input, shape index: {}]   ;;  %s10180_s1 = inlined_call_operand.vmem [shape: f32[2,8,9,9,4], index: 1, kind: input, shape index: {}]   ;;  %s10181_s2 = inlined_call_operand.vmem [shape: f32[32,128], index: 2, kind: input, shape index: {}]   ;;  %s10182_s3 = inlined_call_operand.vmem [shape: f32[1,128], index: 3, kind: input, shape index: {}]   ;;  %s10183_s4 = inlined_call_operand.vmem [shape: f32[2,512,128], index: 4, kind: output, shape index: {}]  }
   0x1   :  { %s8756_s17 = smov 0  }
   0x2 LB: > { %s26_s18 = sadd.s32 1, %s8721_s16  ;;  %p6141_p0 = scmp.ge.s32.totalorder %s8725_s17, 1  ;;  %s8725_s17 = sphi %s8756_s17, %s14_s17   ;;  %s8721_s16 = sphi %s8754_s16, %s10185_s16   ;;  %s8717_s15 = sphi %s8752_s15, %s10184_s15  }
   0x3   : > { %p28_p1 = scmp.ge.s32.totalorder %s26_s18, 2  ;;  %p202_p2 = scmp.lt.s32.totalorder %s8725_s17, 3 }
   0x5   : > { %s10187_s18 = smov (%p28_p1, %s26_s18), 0  ;;  %p203_p3 = pnand %p6141_p0, %p202_p2 }
   0x6   : > { %v408_v0 = vld [vmem:[%s10181_s2 + $0x4] sm:$0xf] (!%p203_p3)  ;;  %vm602_vm0 = vcmask (!%p203_p3), 1043456   ;;  %v3054_v1 = vld [vmem:[%s10181_s2 + $0x10] sm:$0xf] (!%p203_p3)  ;;  %p248_p4 = scmp.lt.s32.totalorder (!%p203_p3), %s8717_s15, 1 }
   0x7   : > { %206 = sbr.rel (%p203_p3) target bundleno = 749 (0x2ed), region = 36  ;;  %7446 = vmatprep.subr.msk.mxu1 (!%p203_p3), %vm602_vm0, %v408_v0  ;;  %7838 = vmatprep.subr.msk.mxu0 (!%p203_p3), %vm602_vm0, %v3054_v1  ;;  %v343_v2 = vld [vmem:[%s10181_s2] sm:$0xf] (!%p203_p3)  ;;  %v3763_v3 = vld [vmem:[%s10181_s2 + $0x14] sm:$0xf] (!%p203_p3)  ;;  %vm409_vm1 = vcmask (!%p203_p3), 31744  }
   0x8   : > { %7447 = vmatpush3.msk.msra.mxu1 (!%p203_p3), %vm602_vm0, %v408_v0  ;;  %7839 = vmatpush3.msk.msra.mxu0 (!%p203_p3), %vm602_vm0, %v3054_v1  ;;  %v8814_v10 = vld [vmem:[%s10181_s2 + $0x8] sm:$0xf] (!%p203_p3)  ;;  %v8819_v11 = vld [vmem:[%s10181_s2 + $0x18] sm:$0xf] (!%p203_p3) }
   0x9   : > { %7544 = vmatprep.subr.msk.mxu1 (!%p203_p3), %vm602_vm0, %v343_v2  ;;  %7936 = vmatprep.subr.msk.mxu0 (!%p203_p3), %vm602_vm0, %v3763_v3 }
   0xe   : > { %s10189_s15 = smov (!%p248_p4, %s8717_s15), 1 }
   0xf   : > { %s8678_s27 = smul.u32 1152, %s10189_s15  ;;  %s6925_s22 = sshll.u32 %s10189_s15, 9 }
  0x10   : > { %s10041_s25 = scalar_lea.vmem %s10183_s4, %s6925_s22 }
  0x11   : > { %s8794_s30 = scalar_lea.vmem %s10179_s0, %s8678_s27  ;;  %s8799_s7 = scalar_lea.vmem %s10180_s1, %s8678_s27 }
  0x12   : > { %v344_v4 = vld [vmem:[%s8794_s30 + $0x1] sm:$0xff]  ;;  %v345_v6 = vld [vmem:[%s8794_s30 + $0x11] sm:$0xff] }
  0x13   : > { %v2990_v5 = vld [vmem:[%s8799_s7] sm:$0xff]  ;;  %7448 = vmatprep.mubr.msk.f32.mxu1 %vm409_vm1, %v344_v4  ;;  %v2991_v7 = vld [vmem:[%s8799_s7 + $0x10] sm:$0xff] }
  0x14   : > { %7840 = vmatprep.mubr.msk.f32.mxu0 %vm409_vm1, %v2990_v5  ;;  %v346_v8 = vld [vmem:[%s8794_s30 + $0x21] sm:$0xff]  ;;  %7449 = vmatmul.mubr.msk.f32.vlgmr.msra.gmra.mrb[0].mxu1 %vm409_vm1, %v345_v6  ;;  %v347_v12 = vld [vmem:[%s8794_s30 + $0x31] sm:$0xff] }
  0x15   : > { %v2992_v9 = vld [vmem:[%s8799_s7 + $0x20] sm:$0xff]  ;;  %7841 = vmatmul.mubr.msk.f32.vlgmr.msra.gmra.mrb[0].mxu0 %vm409_vm1, %v2991_v7  ;;  %7545 = vmatpush3.msk.msra.mxu1 %vm602_vm0, %v343_v2  ;;  %v2993_v13 = vld [vmem:[%s8799_s7 + $0x30] sm:$0xff] }
  0x16   : > { %7937 = vmatpush3.msk.msra.mxu0 %vm602_vm0, %v3763_v3  ;;  %7451 = vmatprep.mubr.msk.f32.mxu1 %vm409_vm1, %v346_v8  ;;  %v348_v14 = vld [vmem:[%s8794_s30 + $0x41] sm:$0xff]  ;;  %v349_v16 = vld [vmem:[%s8794_s30 + $0x51] sm:$0xff] }
  0x17   : > { %7843 = vmatprep.mubr.msk.f32.mxu0 %vm409_vm1, %v2992_v9  ;;  %v2994_v15 = vld [vmem:[%s8799_s7 + $0x40] sm:$0xff]  ;;  %7642 = vmatprep.subr.msk.mxu1 %vm602_vm0, %v8814_v10  ;;  %v2995_v17 = vld [vmem:[%s8799_s7 + $0x50] sm:$0xff] }
  0x18   : > { %8034 = vmatprep.subr.msk.mxu0 %vm602_vm0, %v8819_v11  ;;  %7452 = vmatmul.mubr.msk.f32.gmra.mrb[2].mxu1 %vm409_vm1, %v347_v12  ;;  %v350_v18 = vld [vmem:[%s8794_s30 + $0x61] sm:$0xff]  ;;  %v351_v20 = vld [vmem:[%s8794_s30 + $0x71] sm:$0xff] }
  0x19   : > { %7844 = vmatmul.mubr.msk.f32.gmra.mrb[2].mxu0 %vm409_vm1, %v2993_v13  ;;  %7454 = vmatprep.mubr.msk.f32.mxu1 %vm409_vm1, %v348_v14  ;;  %v2996_v19 = vld [vmem:[%s8799_s7 + $0x60] sm:$0xff]  ;;  %v2997_v21 = vld [vmem:[%s8799_s7 + $0x70] sm:$0xff] }
  0x1a   : > { %7846 = vmatprep.mubr.msk.f32.mxu0 %vm409_vm1, %v2994_v15  ;;  %v352_v22 = vld [vmem:[%s8794_s30 + $0x91] sm:$0xff]  ;;  %v353_v24 = vld [vmem:[%s8794_s30 + $0xa1] sm:$0xff] }
  0x1b   : > { %v2998_v23 = vld [vmem:[%s8799_s7 + $0x90] sm:$0xff]  ;;  %v2999_v25 = vld [vmem:[%s8799_s7 + $0xa0] sm:$0xff] }
  0x1c   : > { %7455 = vmatmul.mubr.msk.f32.gmra.mrb[4].mxu1 %vm409_vm1, %v349_v16  ;;  %v354_v26 = vld [vmem:[%s8794_s30 + $0xb1] sm:$0xff]  ;;  %v355_v28 = vld [vmem:[%s8794_s30 + $0xc1] sm:$0xff] }
  0x1d   : > { %7847 = vmatmul.mubr.msk.f32.gmra.mrb[4].mxu0 %vm409_vm1, %v2995_v17  ;;  %7457 = vmatprep.mubr.msk.f32.mxu1 %vm409_vm1, %v350_v18  ;;  %v3000_v27 = vld [vmem:[%s8799_s7 + $0xb0] sm:$0xff]  ;;  %v3001_v29 = vld [vmem:[%s8799_s7 + $0xc0] sm:$0xff] }
  0x1e   : > { %7849 = vmatprep.mubr.msk.f32.mxu0 %vm409_vm1, %v2996_v19  ;;  %v356_v30 = vld [vmem:[%s8794_s30 + $0xd1] sm:$0xff]  ;;  %v357_v32 = vld [vmem:[%s8794_s30 + $0xe1] sm:$0xff] }
  0x1f   : > { %v3002_v31 = vld [vmem:[%s8799_s7 + $0xd0] sm:$0xff]  ;;  %v3003_v33 = vld [vmem:[%s8799_s7 + $0xe0] sm:$0xff] }
  0x20   : > { %7458 = vmatmul.mubr.msk.f32.gmra.mrb[6].mxu1 %vm409_vm1, %v351_v20  ;;  %v358_v34 = vld [vmem:[%s8794_s30 + $0xf1] sm:$0xff]  ;;  %v359_v36 = vld [vmem:[%s8794_s30 + $0x101] sm:$0xff] }
  0x21   : > { %7850 = vmatmul.mubr.msk.f32.gmra.mrb[6].mxu0 %vm409_vm1, %v2997_v21  ;;  %7460 = vmatprep.mubr.msk.f32.mxu1 %vm409_vm1, %v352_v22  ;;  %v3004_v35 = vld [vmem:[%s8799_s7 + $0xf0] sm:$0xff]  ;;  %v3005_v37 = vld [vmem:[%s8799_s7 + $0x100] sm:$0xff] }
  0x22   : > { %7852 = vmatprep.mubr.msk.f32.mxu0 %vm409_vm1, %v2998_v23  ;;  %v360_v38 = vld [vmem:[%s8794_s30 + $0x121] sm:$0xff]  ;;  %v361_v40 = vld [vmem:[%s8794_s30 + $0x131] sm:$0xff] }
  0x23   : > { %v3006_v39 = vld [vmem:[%s8799_s7 + $0x120] sm:$0xff]  ;;  %v3007_v41 = vld [vmem:[%s8799_s7 + $0x130] sm:$0xff] }
  0x24   : > { %7461 = vmatmul.mubr.msk.f32.gmra.mrb[8].mxu1 %vm409_vm1, %v353_v24  ;;  %v362_v42 = vld [vmem:[%s8794_s30 + $0x141] sm:$0xff]  ;;  %v363_v44 = vld [vmem:[%s8794_s30 + $0x151] sm:$0xff] }
  0x25   : > { %7853 = vmatmul.mubr.msk.f32.gmra.mrb[8].mxu0 %vm409_vm1, %v2999_v25  ;;  %7463 = vmatprep.mubr.msk.f32.mxu1 %vm409_vm1, %v354_v26  ;;  %v3008_v43 = vld [vmem:[%s8799_s7 + $0x140] sm:$0xff]  ;;  %v3009_v45 = vld [vmem:[%s8799_s7 + $0x150] sm:$0xff] }
  0x26   : > { %7855 = vmatprep.mubr.msk.f32.mxu0 %vm409_vm1, %v3000_v27  ;;  %v364_v46 = vld [vmem:[%s8794_s30 + $0x161] sm:$0xff]  ;;  %v365_v48 = vld [vmem:[%s8794_s30 + $0x171] sm:$0xff] }
  0x27   : > { %v3010_v47 = vld [vmem:[%s8799_s7 + $0x160] sm:$0xff]  ;;  %v3011_v49 = vld [vmem:[%s8799_s7 + $0x170] sm:$0xff] }
  0x28   : > { %7464 = vmatmul.mubr.msk.f32.gmra.mrb[10].mxu1 %vm409_vm1, %v355_v28  ;;  %v366_v50 = vld [vmem:[%s8794_s30 + $0x181] sm:$0xff]  ;;  %v367_v52 = vld [vmem:[%s8794_s30 + $0x191] sm:$0xff] }
  0x29   : > { %7856 = vmatmul.mubr.msk.f32.gmra.mrb[10].mxu0 %vm409_vm1, %v3001_v29  ;;  %7466 = vmatprep.mubr.msk.f32.mxu1 %vm409_vm1, %v356_v30  ;;  %v3012_v51 = vld [vmem:[%s8799_s7 + $0x180] sm:$0xff]  ;;  %v3013_v53 = vld [vmem:[%s8799_s7 + $0x190] sm:$0xff] }
  0x2a   : > { %7858 = vmatprep.mubr.msk.f32.mxu0 %vm409_vm1, %v3002_v31  ;;  %v368_v54 = vld [vmem:[%s8794_s30 + $0x1b1] sm:$0xff]  ;;  %v369_v56 = vld [vmem:[%s8794_s30 + $0x1c1] sm:$0xff] }
  0x2b   : > { %v3014_v55 = vld [vmem:[%s8799_s7 + $0x1b0] sm:$0xff]  ;;  %v3015_v57 = vld [vmem:[%s8799_s7 + $0x1c0] sm:$0xff] }
  0x2c   : > { %7467 = vmatmul.mubr.msk.f32.gmra.mrb[12].mxu1 %vm409_vm1, %v357_v32  ;;  %v370_v58 = vld [vmem:[%s8794_s30 + $0x1d1] sm:$0xff]  ;;  %v371_v60 = vld [vmem:[%s8794_s30 + $0x1e1] sm:$0xff] }
  0x2d   : > { %7859 = vmatmul.mubr.msk.f32.gmra.mrb[12].mxu0 %vm409_vm1, %v3003_v33  ;;  %7469 = vmatprep.mubr.msk.f32.mxu1 %vm409_vm1, %v358_v34  ;;  %v3016_v59 = vld [vmem:[%s8799_s7 + $0x1d0] sm:$0xff]  ;;  %v3017_v61 = vld [vmem:[%s8799_s7 + $0x1e0] sm:$0xff] }
  0x2e   : > { %7861 = vmatprep.mubr.msk.f32.mxu0 %vm409_vm1, %v3004_v35  ;;  %v372_v62 = vld [vmem:[%s8794_s30 + $0x1f1] sm:$0xff]  ;;  %v373_v0 = vld [vmem:[%s8794_s30 + $0x201] sm:$0xff] }
  0x2f   : > { %v3018_v63 = vld [vmem:[%s8799_s7 + $0x1f0] sm:$0xff]  ;;  %v3019_v1 = vld [vmem:[%s8799_s7 + $0x200] sm:$0xff] }
  0x30   : > { %7470 = vmatmul.mubr.msk.f32.gmra.mrb[14].mxu1 %vm409_vm1, %v359_v36  ;;  %v374_v2 = vld [vmem:[%s8794_s30 + $0x211] sm:$0xff]  ;;  %v375_v4 = vld [vmem:[%s8794_s30 + $0x221] sm:$0xff] }
  0x31   : > { %7862 = vmatmul.mubr.msk.f32.gmra.mrb[14].mxu0 %vm409_vm1, %v3005_v37  ;;  %7472 = vmatprep.mubr.msk.f32.mxu1 %vm409_vm1, %v360_v38  ;;  %v3020_v3 = vld [vmem:[%s8799_s7 + $0x210] sm:$0xff]  ;;  %v3021_v5 = vld [vmem:[%s8799_s7 + $0x220] sm:$0xff] }
  0x32   : > { %7864 = vmatprep.mubr.msk.f32.mxu0 %vm409_vm1, %v3006_v39  ;;  %v376_v6 = vld [vmem:[%s8794_s30 + $0x241] sm:$0xff]  ;;  %v377_v8 = vld [vmem:[%s8794_s30 + $0x251] sm:$0xff] }
  0x33   : > { %v3022_v7 = vld [vmem:[%s8799_s7 + $0x240] sm:$0xff]  ;;  %v3023_v9 = vld [vmem:[%s8799_s7 + $0x250] sm:$0xff] }
  0x34   : > { %7473 = vmatmul.mubr.msk.f32.gmra.mrb[16].mxu1 %vm409_vm1, %v361_v40  ;;  %v378_v12 = vld [vmem:[%s8794_s30 + $0x261] sm:$0xff]  ;;  %v379_v14 = vld [vmem:[%s8794_s30 + $0x271] sm:$0xff] }
  0x35   : > { %7865 = vmatmul.mubr.msk.f32.gmra.mrb[16].mxu0 %vm409_vm1, %v3007_v41  ;;  %7475 = vmatprep.mubr.msk.f32.mxu1 %vm409_vm1, %v362_v42  ;;  %v3024_v13 = vld [vmem:[%s8799_s7 + $0x260] sm:$0xff]  ;;  %v3025_v15 = vld [vmem:[%s8799_s7 + $0x270] sm:$0xff] }
  0x36   : > { %7867 = vmatprep.mubr.msk.f32.mxu0 %vm409_vm1, %v3008_v43  ;;  %v380_v16 = vld [vmem:[%s8794_s30 + $0x281] sm:$0xff]  ;;  %v381_v18 = vld [vmem:[%s8794_s30 + $0x291] sm:$0xff] }
  0x37   : > { %v3026_v17 = vld [vmem:[%s8799_s7 + $0x280] sm:$0xff]  ;;  %v3027_v19 = vld [vmem:[%s8799_s7 + $0x290] sm:$0xff] }
  0x38   : > { %7476 = vmatmul.mubr.msk.f32.gmra.mrb[18].mxu1 %vm409_vm1, %v363_v44  ;;  %v382_v20 = vld [vmem:[%s8794_s30 + $0x2a1] sm:$0xff]  ;;  %v383_v22 = vld [vmem:[%s8794_s30 + $0x2b1] sm:$0xff] }
  0x39   : > { %7868 = vmatmul.mubr.msk.f32.gmra.mrb[18].mxu0 %vm409_vm1, %v3009_v45  ;;  %7478 = vmatprep.mubr.msk.f32.mxu1 %vm409_vm1, %v364_v46  ;;  %v3028_v21 = vld [vmem:[%s8799_s7 + $0x2a0] sm:$0xff]  ;;  %v3029_v23 = vld [vmem:[%s8799_s7 + $0x2b0] sm:$0xff] }
  0x3a   : > { %7870 = vmatprep.mubr.msk.f32.mxu0 %vm409_vm1, %v3010_v47  ;;  %v384_v24 = vld [vmem:[%s8794_s30 + $0x2d1] sm:$0xff]  ;;  %v385_v26 = vld [vmem:[%s8794_s30 + $0x2e1] sm:$0xff] }
  0x3b   : > { %v3030_v25 = vld [vmem:[%s8799_s7 + $0x2d0] sm:$0xff]  ;;  %v3031_v27 = vld [vmem:[%s8799_s7 + $0x2e0] sm:$0xff] }
  0x3c   : > { %7479 = vmatmul.mubr.msk.f32.gmra.mrb[20].mxu1 %vm409_vm1, %v365_v48  ;;  %v386_v28 = vld [vmem:[%s8794_s30 + $0x2f1] sm:$0xff]  ;;  %v387_v30 = vld [vmem:[%s8794_s30 + $0x301] sm:$0xff] }
  0x3d   : > { %7871 = vmatmul.mubr.msk.f32.gmra.mrb[20].mxu0 %vm409_vm1, %v3011_v49  ;;  %7481 = vmatprep.mubr.msk.f32.mxu1 %vm409_vm1, %v366_v50  ;;  %v3032_v29 = vld [vmem:[%s8799_s7 + $0x2f0] sm:$0xff]  ;;  %v3033_v31 = vld [vmem:[%s8799_s7 + $0x300] sm:$0xff] }
  0x3e   : > { %7873 = vmatprep.mubr.msk.f32.mxu0 %vm409_vm1, %v3012_v51  ;;  %v388_v32 = vld [vmem:[%s8794_s30 + $0x311] sm:$0xff]  ;;  %v389_v34 = vld [vmem:[%s8794_s30 + $0x321] sm:$0xff] }
  0x3f   : > { %v3034_v33 = vld [vmem:[%s8799_s7 + $0x310] sm:$0xff]  ;;  %v3035_v35 = vld [vmem:[%s8799_s7 + $0x320] sm:$0xff] }
  0x40   : > { %7482 = vmatmul.mubr.msk.f32.gmra.mrb[22].mxu1 %vm409_vm1, %v367_v52  ;;  %v390_v36 = vld [vmem:[%s8794_s30 + $0x331] sm:$0xff]  ;;  %v391_v38 = vld [vmem:[%s8794_s30 + $0x341] sm:$0xff] }
  0x41   : > { %7874 = vmatmul.mubr.msk.f32.gmra.mrb[22].mxu0 %vm409_vm1, %v3013_v53  ;;  %7484 = vmatprep.mubr.msk.f32.mxu1 %vm409_vm1, %v368_v54  ;;  %v3036_v37 = vld [vmem:[%s8799_s7 + $0x330] sm:$0xff]  ;;  %v3037_v39 = vld [vmem:[%s8799_s7 + $0x340] sm:$0xff] }
  0x42   : > { %7876 = vmatprep.mubr.msk.f32.mxu0 %vm409_vm1, %v3014_v55  ;;  %v392_v40 = vld [vmem:[%s8794_s30 + $0x361] sm:$0xff]  ;;  %v393_v42 = vld [vmem:[%s8794_s30 + $0x371] sm:$0xff] }
  0x43   : > { %v3038_v41 = vld [vmem:[%s8799_s7 + $0x360] sm:$0xff]  ;;  %v3039_v43 = vld [vmem:[%s8799_s7 + $0x370] sm:$0xff] }
  0x44   : > { %7485 = vmatmul.mubr.msk.f32.gmra.mrb[24].mxu1 %vm409_vm1, %v369_v56  ;;  %v394_v44 = vld [vmem:[%s8794_s30 + $0x381] sm:$0xff]  ;;  %v395_v46 = vld [vmem:[%s8794_s30 + $0x391] sm:$0xff] }
  0x45   : > { %7877 = vmatmul.mubr.msk.f32.gmra.mrb[24].mxu0 %vm409_vm1, %v3015_v57  ;;  %7487 = vmatprep.mubr.msk.f32.mxu1 %vm409_vm1, %v370_v58  ;;  %v3040_v45 = vld [vmem:[%s8799_s7 + $0x380] sm:$0xff]  ;;  %v3041_v47 = vld [vmem:[%s8799_s7 + $0x390] sm:$0xff] }
  0x46   : > { %7879 = vmatprep.mubr.msk.f32.mxu0 %vm409_vm1, %v3016_v59  ;;  %v396_v48 = vld [vmem:[%s8794_s30 + $0x3a1] sm:$0xff]  ;;  %v397_v50 = vld [vmem:[%s8794_s30 + $0x3b1] sm:$0xff] }
  0x47   : > { %v3042_v49 = vld [vmem:[%s8799_s7 + $0x3a0] sm:$0xff]  ;;  %v3043_v51 = vld [vmem:[%s8799_s7 + $0x3b0] sm:$0xff] }
  0x48   : > { %7488 = vmatmul.mubr.msk.f32.gmra.mrb[26].mxu1 %vm409_vm1, %v371_v60  ;;  %v398_v52 = vld [vmem:[%s8794_s30 + $0x3c1] sm:$0xff]  ;;  %v399_v54 = vld [vmem:[%s8794_s30 + $0x3d1] sm:$0xff] }
  0x49   : > { %7880 = vmatmul.mubr.msk.f32.gmra.mrb[26].mxu0 %vm409_vm1, %v3017_v61  ;;  %7490 = vmatprep.mubr.msk.f32.mxu1 %vm409_vm1, %v372_v62  ;;  %v3044_v53 = vld [vmem:[%s8799_s7 + $0x3c0] sm:$0xff]  ;;  %v3045_v55 = vld [vmem:[%s8799_s7 + $0x3d0] sm:$0xff] }
  0x4a   : > { %7882 = vmatprep.mubr.msk.f32.mxu0 %vm409_vm1, %v3018_v63  ;;  %v400_v56 = vld [vmem:[%s8794_s30 + $0x3f1] sm:$0xff]  ;;  %v401_v58 = vld [vmem:[%s8794_s30 + $0x401] sm:$0xff] }
  0x4b   : > { %v3046_v57 = vld [vmem:[%s8799_s7 + $0x3f0] sm:$0xff]  ;;  %v3047_v59 = vld [vmem:[%s8799_s7 + $0x400] sm:$0xff] }
  0x4c   : > { %7491 = vmatmul.mubr.msk.f32.gmra.mrb[28].mxu1 %vm409_vm1, %v373_v0  ;;  %v402_v60 = vld [vmem:[%s8794_s30 + $0x411] sm:$0xff]  ;;  %v403_v62 = vld [vmem:[%s8794_s30 + $0x421] sm:$0xff] }
  0x4d   : > { %7883 = vmatmul.mubr.msk.f32.gmra.mrb[28].mxu0 %vm409_vm1, %v3019_v1  ;;  %7493 = vmatprep.mubr.msk.f32.mxu1 %vm409_vm1, %v374_v2  ;;  %v3048_v61 = vld [vmem:[%s8799_s7 + $0x410] sm:$0xff]  ;;  %v3049_v63 = vld [vmem:[%s8799_s7 + $0x420] sm:$0xff] }
  0x4e   : > { %7885 = vmatprep.mubr.msk.f32.mxu0 %vm409_vm1, %v3020_v3  ;;  %v404_v0 = vld [vmem:[%s8794_s30 + $0x431] sm:$0xff]  ;;  %v405_v2 = vld [vmem:[%s8794_s30 + $0x441] sm:$0xff] }
  0x4f   : > { %v3050_v1 = vld [vmem:[%s8799_s7 + $0x430] sm:$0xff]  ;;  %v3051_v3 = vld [vmem:[%s8799_s7 + $0x440] sm:$0xff] }
  0x50   : > { %7494 = vmatmul.mubr.msk.f32.gmra.mrb[30].mxu1 %vm409_vm1, %v375_v4  ;;  %v406_v4 = vld [vmem:[%s8794_s30 + $0x451] sm:$0xff] }
  0x51   : > { %7886 = vmatmul.mubr.msk.f32.gmra.mrb[30].mxu0 %vm409_vm1, %v3021_v5  ;;  %7496 = vmatprep.mubr.msk.f32.mxu1 %vm409_vm1, %v376_v6  ;;  %v3052_v5 = vld [vmem:[%s8799_s7 + $0x450] sm:$0xff]  ;;  %v407_v6 = vld [vmem:[%s8794_s30 + $0x461] sm:$0xff] }
  0x52   : > { %7888 = vmatprep.mubr.msk.f32.mxu0 %vm409_vm1, %v3022_v7  ;;  %v3053_v7 = vld [vmem:[%s8799_s7 + $0x460] sm:$0xff] }
  0x54   : > { %7497 = vmatmul.mubr.msk.f32.gmra.mrb[32].mxu1 %vm409_vm1, %v377_v8  ;;  %v279_v8 = vld [vmem:[%s8794_s30] sm:$0xff] }
  0x55   : > { %7889 = vmatmul.mubr.msk.f32.gmra.mrb[32].mxu0 %vm409_vm1, %v3023_v9  ;;  %7499 = vmatprep.mubr.msk.f32.mxu1 %vm409_vm1, %v378_v12  ;;  %v3699_v9 = vld [vmem:[%s8799_s7 + $0x1] sm:$0xff]  ;;  %v9078_v12 = vld [vmem:[%s8794_s30 + $0x10] sm:$0xff] }
  0x56   : > { %7891 = vmatprep.mubr.msk.f32.mxu0 %vm409_vm1, %v3024_v13  ;;  %v3700_v13 = vld [vmem:[%s8799_s7 + $0x11] sm:$0xff] }
  0x58   : > { %7500 = vmatmul.mubr.msk.f32.gmra.mrb[34].mxu1 %vm409_vm1, %v379_v14  ;;  %v9082_v14 = vld [vmem:[%s8794_s30 + $0x20] sm:$0xff] }
  0x59   : > { %7892 = vmatmul.mubr.msk.f32.gmra.mrb[34].mxu0 %vm409_vm1, %v3025_v15  ;;  %7502 = vmatprep.mubr.msk.f32.mxu1 %vm409_vm1, %v380_v16  ;;  %v3701_v15 = vld [vmem:[%s8799_s7 + $0x21] sm:$0xff]  ;;  %v9091_v16 = vld [vmem:[%s10181_s2 + $0xc] sm:$0xf] }
  0x5a   : > { %7894 = vmatprep.mubr.msk.f32.mxu0 %vm409_vm1, %v3026_v17  ;;  %v9096_v17 = vld [vmem:[%s10181_s2 + $0x1c] sm:$0xf] }
  0x5c   : > { %7503 = vmatmul.mubr.msk.f32.gmra.mrb[36].mxu1 %vm409_vm1, %v381_v18  ;;  %v9103_v18 = vld [vmem:[%s8794_s30 + $0x30] sm:$0xff] }
  0x5d   : > { %7895 = vmatmul.mubr.msk.f32.gmra.mrb[36].mxu0 %vm409_vm1, %v3027_v19  ;;  %7505 = vmatprep.mubr.msk.f32.mxu1 %vm409_vm1, %v382_v20  ;;  %v3702_v19 = vld [vmem:[%s8799_s7 + $0x31] sm:$0xff]  ;;  %v9110_v20 = vld [vmem:[%s8794_s30 + $0x40] sm:$0xff] }
  0x5e   : > { %7897 = vmatprep.mubr.msk.f32.mxu0 %vm409_vm1, %v3028_v21  ;;  %v3703_v21 = vld [vmem:[%s8799_s7 + $0x41] sm:$0xff] }
  0x60   : > { %7506 = vmatmul.mubr.msk.f32.gmra.mrb[38].mxu1 %vm409_vm1, %v383_v22  ;;  %v9128_v22 = vld [vmem:[%s8794_s30 + $0x60] sm:$0xff] }
  0x61   : > { %7898 = vmatmul.mubr.msk.f32.gmra.mrb[38].mxu0 %vm409_vm1, %v3029_v23  ;;  %7508 = vmatprep.mubr.msk.f32.mxu1 %vm409_vm1, %v384_v24  ;;  %v3705_v23 = vld [vmem:[%s8799_s7 + $0x61] sm:$0xff]  ;;  %v9138_v24 = vld [vmem:[%s8794_s30 + $0x70] sm:$0xff] }
  0x62   : > { %7900 = vmatprep.mubr.msk.f32.mxu0 %vm409_vm1, %v3030_v25  ;;  %v3706_v25 = vld [vmem:[%s8799_s7 + $0x71] sm:$0xff] }
  0x64   : > { %7509 = vmatmul.mubr.msk.f32.gmra.mrb[40].mxu1 %vm409_vm1, %v385_v26  ;;  %v287_v26 = vld [vmem:[%s8794_s30 + $0x90] sm:$0xff] }
  0x65   : > { %7901 = vmatmul.mubr.msk.f32.gmra.mrb[40].mxu0 %vm409_vm1, %v3031_v27  ;;  %7511 = vmatprep.mubr.msk.f32.mxu1 %vm409_vm1, %v386_v28  ;;  %v3707_v27 = vld [vmem:[%s8799_s7 + $0x91] sm:$0xff]  ;;  %v9149_v28 = vld [vmem:[%s8794_s30 + $0xa0] sm:$0xff] }
  0x66   : > { %7903 = vmatprep.mubr.msk.f32.mxu0 %vm409_vm1, %v3032_v29  ;;  %v3708_v29 = vld [vmem:[%s8799_s7 + $0xa1] sm:$0xff] }
  0x68   : > { %7512 = vmatmul.mubr.msk.f32.gmra.mrb[42].mxu1 %vm409_vm1, %v387_v30  ;;  %v9153_v30 = vld [vmem:[%s8794_s30 + $0xb0] sm:$0xff] }
  0x69   : > { %7904 = vmatmul.mubr.msk.f32.gmra.mrb[42].mxu0 %vm409_vm1, %v3033_v31  ;;  %7514 = vmatprep.mubr.msk.f32.mxu1 %vm409_vm1, %v388_v32  ;;  %v3709_v31 = vld [vmem:[%s8799_s7 + $0xb1] sm:$0xff]  ;;  %v9163_v32 = vld [vmem:[%s8794_s30 + $0xc0] sm:$0xff] }
  0x6a   : > { %7906 = vmatprep.mubr.msk.f32.mxu0 %vm409_vm1, %v3034_v33  ;;  %v3710_v33 = vld [vmem:[%s8799_s7 + $0xc1] sm:$0xff] }
  0x6c   : > { %7515 = vmatmul.mubr.msk.f32.gmra.mrb[44].mxu1 %vm409_vm1, %v389_v34  ;;  %v9167_v34 = vld [vmem:[%s8794_s30 + $0xd0] sm:$0xff] }
  0x6d   : > { %7907 = vmatmul.mubr.msk.f32.gmra.mrb[44].mxu0 %vm409_vm1, %v3035_v35  ;;  %7517 = vmatprep.mubr.msk.f32.mxu1 %vm409_vm1, %v390_v36  ;;  %v3711_v35 = vld [vmem:[%s8799_s7 + $0xd1] sm:$0xff]  ;;  %v9177_v36 = vld [vmem:[%s8794_s30 + $0xe0] sm:$0xff] }
  0x6e   : > { %7909 = vmatprep.mubr.msk.f32.mxu0 %vm409_vm1, %v3036_v37  ;;  %v3712_v37 = vld [vmem:[%s8799_s7 + $0xe1] sm:$0xff] }
  0x70   : > { %7518 = vmatmul.mubr.msk.f32.gmra.mrb[46].mxu1 %vm409_vm1, %v391_v38  ;;  %v9181_v38 = vld [vmem:[%s8794_s30 + $0xf0] sm:$0xff] }
  0x71   : > { %7910 = vmatmul.mubr.msk.f32.gmra.mrb[46].mxu0 %vm409_vm1, %v3037_v39  ;;  %7520 = vmatprep.mubr.msk.f32.mxu1 %vm409_vm1, %v392_v40  ;;  %v3713_v39 = vld [vmem:[%s8799_s7 + $0xf1] sm:$0xff]  ;;  %v9191_v40 = vld [vmem:[%s8794_s30 + $0x100] sm:$0xff] }
  0x72   : > { %7912 = vmatprep.mubr.msk.f32.mxu0 %vm409_vm1, %v3038_v41  ;;  %v3714_v41 = vld [vmem:[%s8799_s7 + $0x101] sm:$0xff] }
  0x74   : > { %7521 = vmatmul.mubr.msk.f32.gmra.mrb[48].mxu1 %vm409_vm1, %v393_v42  ;;  %v295_v42 = vld [vmem:[%s8794_s30 + $0x120] sm:$0xff] }
  0x75   : > { %7913 = vmatmul.mubr.msk.f32.gmra.mrb[48].mxu0 %vm409_vm1, %v3039_v43  ;;  %7523 = vmatprep.mubr.msk.f32.mxu1 %vm409_vm1, %v394_v44  ;;  %v3715_v43 = vld [vmem:[%s8799_s7 + $0x121] sm:$0xff]  ;;  %v9202_v44 = vld [vmem:[%s8794_s30 + $0x130] sm:$0xff] }
  0x76   : > { %7915 = vmatprep.mubr.msk.f32.mxu0 %vm409_vm1, %v3040_v45  ;;  %v3716_v45 = vld [vmem:[%s8799_s7 + $0x131] sm:$0xff] }
  0x78   : > { %7524 = vmatmul.mubr.msk.f32.gmra.mrb[50].mxu1 %vm409_vm1, %v395_v46  ;;  %v9206_v46 = vld [vmem:[%s8794_s30 + $0x140] sm:$0xff] }
  0x79   : > { %7916 = vmatmul.mubr.msk.f32.gmra.mrb[50].mxu0 %vm409_vm1, %v3041_v47  ;;  %7526 = vmatprep.mubr.msk.f32.mxu1 %vm409_vm1, %v396_v48  ;;  %v3717_v47 = vld [vmem:[%s8799_s7 + $0x141] sm:$0xff]  ;;  %v9216_v48 = vld [vmem:[%s8794_s30 + $0x150] sm:$0xff] }
  0x7a   : > { %7918 = vmatprep.mubr.msk.f32.mxu0 %vm409_vm1, %v3042_v49  ;;  %v3718_v49 = vld [vmem:[%s8799_s7 + $0x151] sm:$0xff] }
  0x7c   : > { %7527 = vmatmul.mubr.msk.f32.gmra.mrb[52].mxu1 %vm409_vm1, %v397_v50  ;;  %v9220_v50 = vld [vmem:[%s8794_s30 + $0x160] sm:$0xff] }
  0x7d   : > { %7919 = vmatmul.mubr.msk.f32.gmra.mrb[52].mxu0 %vm409_vm1, %v3043_v51  ;;  %7529 = vmatprep.mubr.msk.f32.mxu1 %vm409_vm1, %v398_v52  ;;  %v3719_v51 = vld [vmem:[%s8799_s7 + $0x161] sm:$0xff]  ;;  %v9230_v52 = vld [vmem:[%s8794_s30 + $0x170] sm:$0xff] }
  0x7e   : > { %7921 = vmatprep.mubr.msk.f32.mxu0 %vm409_vm1, %v3044_v53  ;;  %v3720_v53 = vld [vmem:[%s8799_s7 + $0x171] sm:$0xff] }
  0x80   : > { %7530 = vmatmul.mubr.msk.f32.gmra.mrb[54].mxu1 %vm409_vm1, %v399_v54  ;;  %v9234_v54 = vld [vmem:[%s8794_s30 + $0x180] sm:$0xff] }
  0x81   : > { %7922 = vmatmul.mubr.msk.f32.gmra.mrb[54].mxu0 %vm409_vm1, %v3045_v55  ;;  %7532 = vmatprep.mubr.msk.f32.mxu1 %vm409_vm1, %v400_v56  ;;  %v3721_v55 = vld [vmem:[%s8799_s7 + $0x181] sm:$0xff]  ;;  %v9244_v56 = vld [vmem:[%s8794_s30 + $0x190] sm:$0xff] }
  0x82   : > { %7924 = vmatprep.mubr.msk.f32.mxu0 %vm409_vm1, %v3046_v57  ;;  %v3722_v57 = vld [vmem:[%s8799_s7 + $0x191] sm:$0xff] }
  0x84   : > { %7533 = vmatmul.mubr.msk.f32.gmra.mrb[56].mxu1 %vm409_vm1, %v401_v58  ;;  %v303_v58 = vld [vmem:[%s8794_s30 + $0x1b0] sm:$0xff] }
  0x85   : > { %7925 = vmatmul.mubr.msk.f32.gmra.mrb[56].mxu0 %vm409_vm1, %v3047_v59  ;;  %7535 = vmatprep.mubr.msk.f32.mxu1 %vm409_vm1, %v402_v60  ;;  %v3723_v59 = vld [vmem:[%s8799_s7 + $0x1b1] sm:$0xff]  ;;  %v9255_v60 = vld [vmem:[%s8794_s30 + $0x1c0] sm:$0xff] }
  0x86   : > { %7927 = vmatprep.mubr.msk.f32.mxu0 %vm409_vm1, %v3048_v61  ;;  %v3724_v61 = vld [vmem:[%s8799_s7 + $0x1c1] sm:$0xff] }
  0x88   : > { %7536 = vmatmul.mubr.msk.f32.gmra.mrb[58].mxu1 %vm409_vm1, %v403_v62  ;;  %v9259_v62 = vld [vmem:[%s8794_s30 + $0x1d0] sm:$0xff] }
  0x89   : > { %7928 = vmatmul.mubr.msk.f32.gmra.mrb[58].mxu0 %vm409_vm1, %v3049_v63  ;;  %7538 = vmatprep.mubr.msk.f32.mxu1 %vm409_vm1, %v404_v0  ;;  %v3725_v63 = vld [vmem:[%s8799_s7 + $0x1d1] sm:$0xff]  ;;  %v9269_v0 = vld [vmem:[%s8794_s30 + $0x1e0] sm:$0xff] }
  0x8a   : > { %7930 = vmatprep.mubr.msk.f32.mxu0 %vm409_vm1, %v3050_v1  ;;  %v3726_v1 = vld [vmem:[%s8799_s7 + $0x1e1] sm:$0xff] }
  0x8c   : > { %7539 = vmatmul.mubr.msk.f32.gmra.mrb[60].mxu1 %vm409_vm1, %v405_v2  ;;  %v9273_v2 = vld [vmem:[%s8794_s30 + $0x1f0] sm:$0xff] }
  0x8d   : > { %7931 = vmatmul.mubr.msk.f32.gmra.mrb[60].mxu0 %vm409_vm1, %v3051_v3  ;;  %7541 = vmatprep.mubr.msk.f32.mxu1 %vm409_vm1, %v406_v4  ;;  %v3727_v3 = vld [vmem:[%s8799_s7 + $0x1f1] sm:$0xff]  ;;  %v9283_v4 = vld [vmem:[%s8794_s30 + $0x200] sm:$0xff] }
  0x8e   : > { %7933 = vmatprep.mubr.msk.f32.mxu0 %vm409_vm1, %v3052_v5  ;;  %v3728_v5 = vld [vmem:[%s8799_s7 + $0x201] sm:$0xff] }
  0x90   : > { %7542 = vmatmul.mubr.msk.f32.gmra.mrb[62].mxu1 %vm409_vm1, %v407_v6  ;;  %v9287_v6 = vld [vmem:[%s8794_s30 + $0x210] sm:$0xff] }
  0x91   : > { %7934 = vmatmul.mubr.msk.f32.gmra.mrb[62].mxu0 %vm409_vm1, %v3053_v7  ;;  %7546 = vmatprep.mubr.msk.f32.mxu1 %vm409_vm1, %v279_v8  ;;  %v3729_v7 = vld [vmem:[%s8799_s7 + $0x211] sm:$0xff]  ;;  %v9297_v8 = vld [vmem:[%s8794_s30 + $0x220] sm:$0xff] }
  0x92   : > { %7938 = vmatprep.mubr.msk.f32.mxu0 %vm409_vm1, %v3699_v9  ;;  %v3730_v9 = vld [vmem:[%s8799_s7 + $0x221] sm:$0xff] }
  0x94   : > { %7547 = vmatmul.mubr.msk.f32.vlgmr.msra.gmra.mrb[0].mxu1 %vm409_vm1, %v9078_v12 }
  0x95   : > { %7939 = vmatmul.mubr.msk.f32.vlgmr.msra.gmra.mrb[0].mxu0 %vm409_vm1, %v3700_v13  ;;  %7643 = vmatpush3.msk.msra.mxu1 %vm602_vm0, %v8814_v10  ;;  %v9124_v10 = vld [vmem:[%s8794_s30 + $0x50] sm:$0xff]  ;;  %v311_v13 = vld [vmem:[%s8794_s30 + $0x240] sm:$0xff] }
  0x96   : > { %8035 = vmatpush3.msk.msra.mxu0 %vm602_vm0, %v8819_v11  ;;  %7549 = vmatprep.mubr.msk.f32.mxu1 %vm409_vm1, %v9082_v14  ;;  %v3704_v11 = vld [vmem:[%s8799_s7 + $0x51] sm:$0xff] }
  0x97   : > { %7941 = vmatprep.mubr.msk.f32.mxu0 %vm409_vm1, %v3701_v15  ;;  %7740 = vmatprep.subr.msk.mxu1 %vm602_vm0, %v9091_v16  ;;  %v3731_v15 = vld [vmem:[%s8799_s7 + $0x241] sm:$0xff] }
  0x98   : > { %8132 = vmatprep.subr.msk.mxu0 %vm602_vm0, %v9096_v17  ;;  %7550 = vmatmul.mubr.msk.f32.gmra.mrb[2].mxu1 %vm409_vm1, %v9103_v18 }
  0x99   : > { %7942 = vmatmul.mubr.msk.f32.gmra.mrb[2].mxu0 %vm409_vm1, %v3702_v19  ;;  %7552 = vmatprep.mubr.msk.f32.mxu1 %vm409_vm1, %v9110_v20  ;;  %v9308_v19 = vld [vmem:[%s8794_s30 + $0x250] sm:$0xff] }
  0x9a   : > { %7944 = vmatprep.mubr.msk.f32.mxu0 %vm409_vm1, %v3703_v21  ;;  %v3732_v21 = vld [vmem:[%s8799_s7 + $0x251] sm:$0xff] }
  0x9c   : > { %7553 = vmatmul.mubr.msk.f32.gmra.mrb[4].mxu1 %vm409_vm1, %v9124_v10 }
  0x9d   : > { %7945 = vmatmul.mubr.msk.f32.gmra.mrb[4].mxu0 %vm409_vm1, %v3704_v11  ;;  %7555 = vmatprep.mubr.msk.f32.mxu1 %vm409_vm1, %v9128_v22  ;;  %v9312_v11 = vld [vmem:[%s8794_s30 + $0x260] sm:$0xff] }
  0x9e   : > { %7947 = vmatprep.mubr.msk.f32.mxu0 %vm409_vm1, %v3705_v23  ;;  %v3733_v23 = vld [vmem:[%s8799_s7 + $0x261] sm:$0xff] }
  0xa0   : > { %7556 = vmatmul.mubr.msk.f32.gmra.mrb[6].mxu1 %vm409_vm1, %v9138_v24 }
  0xa1   : > { %7948 = vmatmul.mubr.msk.f32.gmra.mrb[6].mxu0 %vm409_vm1, %v3706_v25  ;;  %7558 = vmatprep.mubr.msk.f32.mxu1 %vm409_vm1, %v287_v26  ;;  %v9322_v25 = vld [vmem:[%s8794_s30 + $0x270] sm:$0xff] }
  0xa2   : > { %7950 = vmatprep.mubr.msk.f32.mxu0 %vm409_vm1, %v3707_v27  ;;  %v3734_v26 = vld [vmem:[%s8799_s7 + $0x271] sm:$0xff]  ;;  %v9326_v27 = vld [vmem:[%s8794_s30 + $0x280] sm:$0xff] }
  0xa4   : > { %7559 = vmatmul.mubr.msk.f32.gmra.mrb[8].mxu1 %vm409_vm1, %v9149_v28 }
  0xa5   : > { %7951 = vmatmul.mubr.msk.f32.gmra.mrb[8].mxu0 %vm409_vm1, %v3708_v29  ;;  %7561 = vmatprep.mubr.msk.f32.mxu1 %vm409_vm1, %v9153_v30  ;;  %v3735_v29 = vld [vmem:[%s8799_s7 + $0x281] sm:$0xff] }
  0xa6   : > { %7953 = vmatprep.mubr.msk.f32.mxu0 %vm409_vm1, %v3709_v31  ;;  %v9336_v31 = vld [vmem:[%s8794_s30 + $0x290] sm:$0xff] }
  0xa8   : > { %7562 = vmatmul.mubr.msk.f32.gmra.mrb[10].mxu1 %vm409_vm1, %v9163_v32 }
  0xa9   : > { %7954 = vmatmul.mubr.msk.f32.gmra.mrb[10].mxu0 %vm409_vm1, %v3710_v33  ;;  %7564 = vmatprep.mubr.msk.f32.mxu1 %vm409_vm1, %v9167_v34  ;;  %v3736_v33 = vld [vmem:[%s8799_s7 + $0x291] sm:$0xff] }
  0xaa   : > { %7956 = vmatprep.mubr.msk.f32.mxu0 %vm409_vm1, %v3711_v35  ;;  %v9340_v35 = vld [vmem:[%s8794_s30 + $0x2a0] sm:$0xff] }
  0xac   : > { %7565 = vmatmul.mubr.msk.f32.gmra.mrb[12].mxu1 %vm409_vm1, %v9177_v36 }
  0xad   : > { %7957 = vmatmul.mubr.msk.f32.gmra.mrb[12].mxu0 %vm409_vm1, %v3712_v37  ;;  %7567 = vmatprep.mubr.msk.f32.mxu1 %vm409_vm1, %v9181_v38  ;;  %v3737_v37 = vld [vmem:[%s8799_s7 + $0x2a1] sm:$0xff] }
  0xae   : > { %7959 = vmatprep.mubr.msk.f32.mxu0 %vm409_vm1, %v3713_v39  ;;  %v9350_v39 = vld [vmem:[%s8794_s30 + $0x2b0] sm:$0xff] }
  0xb0   : > { %7568 = vmatmul.mubr.msk.f32.gmra.mrb[14].mxu1 %vm409_vm1, %v9191_v40 }
  0xb1   : > { %7960 = vmatmul.mubr.msk.f32.gmra.mrb[14].mxu0 %vm409_vm1, %v3714_v41  ;;  %7570 = vmatprep.mubr.msk.f32.mxu1 %vm409_vm1, %v295_v42  ;;  %v3738_v41 = vld [vmem:[%s8799_s7 + $0x2b1] sm:$0xff] }
  0xb2   : > { %7962 = vmatprep.mubr.msk.f32.mxu0 %vm409_vm1, %v3715_v43  ;;  %v319_v42 = vld [vmem:[%s8794_s30 + $0x2d0] sm:$0xff] }
  0xb3   : > { %v3739_v43 = vld [vmem:[%s8799_s7 + $0x2d1] sm:$0xff] }
  0xb4   : > { %7571 = vmatmul.mubr.msk.f32.gmra.mrb[16].mxu1 %vm409_vm1, %v9202_v44 }
  0xb5   : > { %7963 = vmatmul.mubr.msk.f32.gmra.mrb[16].mxu0 %vm409_vm1, %v3716_v45  ;;  %7573 = vmatprep.mubr.msk.f32.mxu1 %vm409_vm1, %v9206_v46  ;;  %v9361_v45 = vld [vmem:[%s8794_s30 + $0x2e0] sm:$0xff] }
  0xb6   : > { %7965 = vmatprep.mubr.msk.f32.mxu0 %vm409_vm1, %v3717_v47  ;;  %v3740_v47 = vld [vmem:[%s8799_s7 + $0x2e1] sm:$0xff] }
  0xb8   : > { %7574 = vmatmul.mubr.msk.f32.gmra.mrb[18].mxu1 %vm409_vm1, %v9216_v48 }
  0xb9   : > { %7966 = vmatmul.mubr.msk.f32.gmra.mrb[18].mxu0 %vm409_vm1, %v3718_v49  ;;  %7576 = vmatprep.mubr.msk.f32.mxu1 %vm409_vm1, %v9220_v50  ;;  %v9365_v49 = vld [vmem:[%s8794_s30 + $0x2f0] sm:$0xff] }
  0xba   : > { %7968 = vmatprep.mubr.msk.f32.mxu0 %vm409_vm1, %v3719_v51  ;;  %v3741_v51 = vld [vmem:[%s8799_s7 + $0x2f1] sm:$0xff] }
  0xbc   : > { %7577 = vmatmul.mubr.msk.f32.gmra.mrb[20].mxu1 %vm409_vm1, %v9230_v52 }
  0xbd   : > { %7969 = vmatmul.mubr.msk.f32.gmra.mrb[20].mxu0 %vm409_vm1, %v3720_v53  ;;  %7579 = vmatprep.mubr.msk.f32.mxu1 %vm409_vm1, %v9234_v54  ;;  %v9375_v53 = vld [vmem:[%s8794_s30 + $0x300] sm:$0xff] }
  0xbe   : > { %7971 = vmatprep.mubr.msk.f32.mxu0 %vm409_vm1, %v3721_v55  ;;  %v3742_v55 = vld [vmem:[%s8799_s7 + $0x301] sm:$0xff] }
  0xc0   : > { %7580 = vmatmul.mubr.msk.f32.gmra.mrb[22].mxu1 %vm409_vm1, %v9244_v56 }
  0xc1   : > { %7972 = vmatmul.mubr.msk.f32.gmra.mrb[22].mxu0 %vm409_vm1, %v3722_v57  ;;  %7582 = vmatprep.mubr.msk.f32.mxu1 %vm409_vm1, %v303_v58  ;;  %v9379_v57 = vld [vmem:[%s8794_s30 + $0x310] sm:$0xff] }
  0xc2   : > { %7974 = vmatprep.mubr.msk.f32.mxu0 %vm409_vm1, %v3723_v59  ;;  %v3743_v58 = vld [vmem:[%s8799_s7 + $0x311] sm:$0xff]  ;;  %v9389_v59 = vld [vmem:[%s8794_s30 + $0x320] sm:$0xff] }
  0xc4   : > { %7583 = vmatmul.mubr.msk.f32.gmra.mrb[24].mxu1 %vm409_vm1, %v9255_v60 }
  0xc5   : > { %7975 = vmatmul.mubr.msk.f32.gmra.mrb[24].mxu0 %vm409_vm1, %v3724_v61  ;;  %7585 = vmatprep.mubr.msk.f32.mxu1 %vm409_vm1, %v9259_v62  ;;  %v3744_v61 = vld [vmem:[%s8799_s7 + $0x321] sm:$0xff] }
  0xc6   : > { %7977 = vmatprep.mubr.msk.f32.mxu0 %vm409_vm1, %v3725_v63  ;;  %v9393_v63 = vld [vmem:[%s8794_s30 + $0x330] sm:$0xff] }
  0xc8   : > { %7586 = vmatmul.mubr.msk.f32.gmra.mrb[26].mxu1 %vm409_vm1, %v9269_v0 }
  0xc9   : > { %7978 = vmatmul.mubr.msk.f32.gmra.mrb[26].mxu0 %vm409_vm1, %v3726_v1  ;;  %7588 = vmatprep.mubr.msk.f32.mxu1 %vm409_vm1, %v9273_v2  ;;  %v3745_v1 = vld [vmem:[%s8799_s7 + $0x331] sm:$0xff] }
  0xca   : > { %7980 = vmatprep.mubr.msk.f32.mxu0 %vm409_vm1, %v3727_v3  ;;  %v9403_v3 = vld [vmem:[%s8794_s30 + $0x340] sm:$0xff] }
  0xcc   : > { %7589 = vmatmul.mubr.msk.f32.gmra.mrb[28].mxu1 %vm409_vm1, %v9283_v4 }
  0xcd   : > { %7981 = vmatmul.mubr.msk.f32.gmra.mrb[28].mxu0 %vm409_vm1, %v3728_v5  ;;  %7591 = vmatprep.mubr.msk.f32.mxu1 %vm409_vm1, %v9287_v6  ;;  %v3746_v5 = vld [vmem:[%s8799_s7 + $0x341] sm:$0xff] }
  0xce   : > { %7983 = vmatprep.mubr.msk.f32.mxu0 %vm409_vm1, %v3729_v7  ;;  %v327_v7 = vld [vmem:[%s8794_s30 + $0x360] sm:$0xff] }
  0xd0   : > { %7592 = vmatmul.mubr.msk.f32.gmra.mrb[30].mxu1 %vm409_vm1, %v9297_v8 }
  0xd1   : > { %7984 = vmatmul.mubr.msk.f32.gmra.mrb[30].mxu0 %vm409_vm1, %v3730_v9  ;;  %7594 = vmatprep.mubr.msk.f32.mxu1 %vm409_vm1, %v311_v13  ;;  %v3747_v9 = vld [vmem:[%s8799_s7 + $0x361] sm:$0xff]  ;;  %v9414_v13 = vld [vmem:[%s8794_s30 + $0x370] sm:$0xff] }
  0xd2   : > { %7986 = vmatprep.mubr.msk.f32.mxu0 %vm409_vm1, %v3731_v15  ;;  %v3748_v15 = vld [vmem:[%s8799_s7 + $0x371] sm:$0xff] }
  0xd4   : > { %7595 = vmatmul.mubr.msk.f32.gmra.mrb[32].mxu1 %vm409_vm1, %v9308_v19 }
  0xd5   : > { %7987 = vmatmul.mubr.msk.f32.gmra.mrb[32].mxu0 %vm409_vm1, %v3732_v21  ;;  %7597 = vmatprep.mubr.msk.f32.mxu1 %vm409_vm1, %v9312_v11  ;;  %v9418_v21 = vld [vmem:[%s8794_s30 + $0x380] sm:$0xff] }
  0xd6   : > { %7989 = vmatprep.mubr.msk.f32.mxu0 %vm409_vm1, %v3733_v23  ;;  %v3749_v23 = vld [vmem:[%s8799_s7 + $0x381] sm:$0xff] }
  0xd8   : > { %7598 = vmatmul.mubr.msk.f32.gmra.mrb[34].mxu1 %vm409_vm1, %v9322_v25 }
  0xd9   : > { %7990 = vmatmul.mubr.msk.f32.gmra.mrb[34].mxu0 %vm409_vm1, %v3734_v26  ;;  %7600 = vmatprep.mubr.msk.f32.mxu1 %vm409_vm1, %v9326_v27  ;;  %v9428_v26 = vld [vmem:[%s8794_s30 + $0x390] sm:$0xff] }
  0xda   : > { %7992 = vmatprep.mubr.msk.f32.mxu0 %vm409_vm1, %v3735_v29  ;;  %v3750_v29 = vld [vmem:[%s8799_s7 + $0x391] sm:$0xff] }
  0xdc   : > { %7601 = vmatmul.mubr.msk.f32.gmra.mrb[36].mxu1 %vm409_vm1, %v9336_v31 }
  0xdd   : > { %7993 = vmatmul.mubr.msk.f32.gmra.mrb[36].mxu0 %vm409_vm1, %v3736_v33  ;;  %7603 = vmatprep.mubr.msk.f32.mxu1 %vm409_vm1, %v9340_v35  ;;  %v9432_v33 = vld [vmem:[%s8794_s30 + $0x3a0] sm:$0xff] }
  0xde   : > { %7995 = vmatprep.mubr.msk.f32.mxu0 %vm409_vm1, %v3737_v37  ;;  %v3751_v37 = vld [vmem:[%s8799_s7 + $0x3a1] sm:$0xff] }
  0xe0   : > { %7604 = vmatmul.mubr.msk.f32.gmra.mrb[38].mxu1 %vm409_vm1, %v9350_v39 }
  0xe1   : > { %7996 = vmatmul.mubr.msk.f32.gmra.mrb[38].mxu0 %vm409_vm1, %v3738_v41  ;;  %7606 = vmatprep.mubr.msk.f32.mxu1 %vm409_vm1, %v319_v42  ;;  %v9442_v41 = vld [vmem:[%s8794_s30 + $0x3b0] sm:$0xff] }
  0xe2   : > { %7998 = vmatprep.mubr.msk.f32.mxu0 %vm409_vm1, %v3739_v43  ;;  %v3752_v42 = vld [vmem:[%s8799_s7 + $0x3b1] sm:$0xff]  ;;  %v9446_v43 = vld [vmem:[%s8794_s30 + $0x3c0] sm:$0xff] }
  0xe4   : > { %7607 = vmatmul.mubr.msk.f32.gmra.mrb[40].mxu1 %vm409_vm1, %v9361_v45 }
  0xe5   : > { %7999 = vmatmul.mubr.msk.f32.gmra.mrb[40].mxu0 %vm409_vm1, %v3740_v47  ;;  %7609 = vmatprep.mubr.msk.f32.mxu1 %vm409_vm1, %v9365_v49  ;;  %v3753_v47 = vld [vmem:[%s8799_s7 + $0x3c1] sm:$0xff] }
  0xe6   : > { %8001 = vmatprep.mubr.msk.f32.mxu0 %vm409_vm1, %v3741_v51  ;;  %v9456_v51 = vld [vmem:[%s8794_s30 + $0x3d0] sm:$0xff] }
  0xe8   : > { %7610 = vmatmul.mubr.msk.f32.gmra.mrb[42].mxu1 %vm409_vm1, %v9375_v53 }
  0xe9   : > { %8002 = vmatmul.mubr.msk.f32.gmra.mrb[42].mxu0 %vm409_vm1, %v3742_v55  ;;  %7612 = vmatprep.mubr.msk.f32.mxu1 %vm409_vm1, %v9379_v57  ;;  %v3754_v55 = vld [vmem:[%s8799_s7 + $0x3d1] sm:$0xff] }
  0xea   : > { %8004 = vmatprep.mubr.msk.f32.mxu0 %vm409_vm1, %v3743_v58  ;;  %v335_v58 = vld [vmem:[%s8794_s30 + $0x3f0] sm:$0xff] }
  0xec   : > { %7613 = vmatmul.mubr.msk.f32.gmra.mrb[44].mxu1 %vm409_vm1, %v9389_v59 }
  0xed   : > { %8005 = vmatmul.mubr.msk.f32.gmra.mrb[44].mxu0 %vm409_vm1, %v3744_v61  ;;  %7615 = vmatprep.mubr.msk.f32.mxu1 %vm409_vm1, %v9393_v63  ;;  %v3755_v61 = vld [vmem:[%s8799_s7 + $0x3f1] sm:$0xff] }
  0xee   : > { %8007 = vmatprep.mubr.msk.f32.mxu0 %vm409_vm1, %v3745_v1  ;;  %v9467_v1 = vld [vmem:[%s8794_s30 + $0x400] sm:$0xff] }
  0xf0   : > { %7616 = vmatmul.mubr.msk.f32.gmra.mrb[46].mxu1 %vm409_vm1, %v9403_v3 }
  0xf1   : > { %8008 = vmatmul.mubr.msk.f32.gmra.mrb[46].mxu0 %vm409_vm1, %v3746_v5  ;;  %7618 = vmatprep.mubr.msk.f32.mxu1 %vm409_vm1, %v327_v7  ;;  %v3756_v5 = vld [vmem:[%s8799_s7 + $0x401] sm:$0xff]  ;;  %v9471_v7 = vld [vmem:[%s8794_s30 + $0x410] sm:$0xff] }
  0xf2   : > { %8010 = vmatprep.mubr.msk.f32.mxu0 %vm409_vm1, %v3747_v9  ;;  %v3757_v9 = vld [vmem:[%s8799_s7 + $0x411] sm:$0xff] }
  0xf4   : > { %7619 = vmatmul.mubr.msk.f32.gmra.mrb[48].mxu1 %vm409_vm1, %v9414_v13 }
  0xf5   : > { %8011 = vmatmul.mubr.msk.f32.gmra.mrb[48].mxu0 %vm409_vm1, %v3748_v15  ;;  %7621 = vmatprep.mubr.msk.f32.mxu1 %vm409_vm1, %v9418_v21  ;;  %v9481_v15 = vld [vmem:[%s8794_s30 + $0x420] sm:$0xff] }
  0xf6   : > { %8013 = vmatprep.mubr.msk.f32.mxu0 %vm409_vm1, %v3749_v23  ;;  %v3758_v23 = vld [vmem:[%s8799_s7 + $0x421] sm:$0xff] }
  0xf8   : > { %7622 = vmatmul.mubr.msk.f32.gmra.mrb[50].mxu1 %vm409_vm1, %v9428_v26 }
  0xf9   : > { %8014 = vmatmul.mubr.msk.f32.gmra.mrb[50].mxu0 %vm409_vm1, %v3750_v29  ;;  %7624 = vmatprep.mubr.msk.f32.mxu1 %vm409_vm1, %v9432_v33  ;;  %v9485_v29 = vld [vmem:[%s8794_s30 + $0x430] sm:$0xff] }
  0xfa   : > { %8016 = vmatprep.mubr.msk.f32.mxu0 %vm409_vm1, %v3751_v37  ;;  %v3759_v37 = vld [vmem:[%s8799_s7 + $0x431] sm:$0xff] }
  0xfc   : > { %7625 = vmatmul.mubr.msk.f32.gmra.mrb[52].mxu1 %vm409_vm1, %v9442_v41 }
  0xfd   : > { %8017 = vmatmul.mubr.msk.f32.gmra.mrb[52].mxu0 %vm409_vm1, %v3752_v42  ;;  %7627 = vmatprep.mubr.msk.f32.mxu1 %vm409_vm1, %v9446_v43  ;;  %v9495_v42 = vld [vmem:[%s8794_s30 + $0x440] sm:$0xff] }
  0xfe   : > { %8019 = vmatprep.mubr.msk.f32.mxu0 %vm409_vm1, %v3753_v47  ;;  %v3760_v47 = vld [vmem:[%s8799_s7 + $0x441] sm:$0xff] }
 0x100   : > { %7628 = vmatmul.mubr.msk.f32.gmra.mrb[54].mxu1 %vm409_vm1, %v9456_v51 }
 0x101   : > { %8020 = vmatmul.mubr.msk.f32.gmra.mrb[54].mxu0 %vm409_vm1, %v3754_v55  ;;  %7630 = vmatprep.mubr.msk.f32.mxu1 %vm409_vm1, %v335_v58  ;;  %v9499_v55 = vld [vmem:[%s8794_s30 + $0x450] sm:$0xff] }
 0x102   : > { %8022 = vmatprep.mubr.msk.f32.mxu0 %vm409_vm1, %v3755_v61  ;;  %v3761_v58 = vld [vmem:[%s8799_s7 + $0x451] sm:$0xff]  ;;  %v9509_v61 = vld [vmem:[%s8794_s30 + $0x460] sm:$0xff] }
 0x104   : > { %7631 = vmatmul.mubr.msk.f32.gmra.mrb[56].mxu1 %vm409_vm1, %v9467_v1 }
 0x105   : > { %8023 = vmatmul.mubr.msk.f32.gmra.mrb[56].mxu0 %vm409_vm1, %v3756_v5  ;;  %7633 = vmatprep.mubr.msk.f32.mxu1 %vm409_vm1, %v9471_v7  ;;  %v3762_v5 = vld [vmem:[%s8799_s7 + $0x461] sm:$0xff] }
 0x106   : > { %8025 = vmatprep.mubr.msk.f32.mxu0 %vm409_vm1, %v3757_v9  ;;  %v6664_v9 = vld [vmem:[%s8799_s7 + $0x10] sm:$0xff] }
 0x108   : > { %7634 = vmatmul.mubr.msk.f32.gmra.mrb[58].mxu1 %vm409_vm1, %v9481_v15 }
 0x109   : > { %8026 = vmatmul.mubr.msk.f32.gmra.mrb[58].mxu0 %vm409_vm1, %v3758_v23  ;;  %7636 = vmatprep.mubr.msk.f32.mxu1 %vm409_vm1, %v9485_v29  ;;  %v6665_v23 = vld [vmem:[%s8799_s7 + $0x20] sm:$0xff] }
 0x10a   : > { %8028 = vmatprep.mubr.msk.f32.mxu0 %vm409_vm1, %v3759_v37  ;;  %v6666_v37 = vld [vmem:[%s8799_s7 + $0x30] sm:$0xff] }
 0x10c   : > { %7637 = vmatmul.mubr.msk.f32.gmra.mrb[60].mxu1 %vm409_vm1, %v9495_v42 }
 0x10d   : > { %8029 = vmatmul.mubr.msk.f32.gmra.mrb[60].mxu0 %vm409_vm1, %v3760_v47  ;;  %7639 = vmatprep.mubr.msk.f32.mxu1 %vm409_vm1, %v9499_v55  ;;  %v6668_v47 = vld [vmem:[%s8799_s7 + $0x50] sm:$0xff] }
 0x10e   : > { %8031 = vmatprep.mubr.msk.f32.mxu0 %vm409_vm1, %v3761_v58  ;;  %v6676_v58 = vld [vmem:[%s8799_s7 + $0xe0] sm:$0xff] }
 0x110   : > { %7640 = vmatmul.mubr.msk.f32.gmra.mrb[62].mxu1 %vm409_vm1, %v9509_v61 }
 0x111   : > { %8032 = vmatmul.mubr.msk.f32.gmra.mrb[62].mxu0 %vm409_vm1, %v3762_v5  ;;  %7644 = vmatprep.mubr.msk.f32.mxu1 %vm409_vm1, %v9078_v12  ;;  %v6667_v12 = vld [vmem:[%s8799_s7 + $0x40] sm:$0xff]  ;;  %v6682_v5 = vld [vmem:[%s8799_s7 + $0x150] sm:$0xff] }
 0x112   : > { %8036 = vmatprep.mubr.msk.f32.mxu0 %vm409_vm1, %v6664_v9  ;;  %v6684_v9 = vld [vmem:[%s8799_s7 + $0x170] sm:$0xff] }
 0x114   : > { %7645 = vmatmul.mubr.msk.f32.vlgmr.msra.gmra.mrb[0].mxu1 %vm409_vm1, %v9082_v14  ;;  %v6669_v14 = vld [vmem:[%s8799_s7 + $0x60] sm:$0xff] }
 0x115   : > { %8037 = vmatmul.mubr.msk.f32.vlgmr.msra.gmra.mrb[0].mxu0 %vm409_vm1, %v6665_v23  ;;  %7741 = vmatpush3.msk.msra.mxu1 %vm602_vm0, %v9091_v16  ;;  %v6670_v16 = vld [vmem:[%s8799_s7 + $0x70] sm:$0xff]  ;;  %v6690_v23 = vld [vmem:[%s8799_s7 + $0x1e0] sm:$0xff] }
 0x116   : > { %8133 = vmatpush3.msk.msra.mxu0 %vm602_vm0, %v9096_v17  ;;  %7647 = vmatprep.mubr.msk.f32.mxu1 %vm409_vm1, %v9103_v18  ;;  %v6283_v17 = vld [vmem:[%s8794_s30 + $0x80] sm:$0xff] }
 0x117   : > { %8039 = vmatprep.mubr.msk.f32.mxu0 %vm409_vm1, %v6666_v37  ;;  %v6671_v18 = vld [vmem:[%s8799_s7 + $0x80] sm:$0xff] }
 0x118   : > { %7648 = vmatmul.mubr.msk.f32.gmra.mrb[2].mxu1 %vm409_vm1, %v9110_v20  ;;  %v6672_v20 = vld [vmem:[%s8799_s7 + $0xa0] sm:$0xff] }
 0x119   : > { %8040 = vmatmul.mubr.msk.f32.gmra.mrb[2].mxu0 %vm409_vm1, %v6667_v12  ;;  %7650 = vmatprep.mubr.msk.f32.mxu1 %vm409_vm1, %v9124_v10  ;;  %v6673_v10 = vld [vmem:[%s8799_s7 + $0xb0] sm:$0xff]  ;;  %v6692_v37 = vld [vmem:[%s8799_s7 + $0x200] sm:$0xff] }
 0x11a   : > { %8042 = vmatprep.mubr.msk.f32.mxu0 %vm409_vm1, %v6668_v47  ;;  %v6698_v12 = vld [vmem:[%s8799_s7 + $0x270] sm:$0xff] }
 0x11b   : > { %v6700_v47 = vld [vmem:[%s8799_s7 + $0x290] sm:$0xff] }
 0x11c   : > { %7651 = vmatmul.mubr.msk.f32.gmra.mrb[4].mxu1 %vm409_vm1, %v9128_v22  ;;  %v6674_v22 = vld [vmem:[%s8799_s7 + $0xc0] sm:$0xff] }
 0x11d   : > { %8043 = vmatmul.mubr.msk.f32.gmra.mrb[4].mxu0 %vm409_vm1, %v6669_v14  ;;  %7653 = vmatprep.mubr.msk.f32.mxu1 %vm409_vm1, %v9138_v24  ;;  %v6675_v24 = vld [vmem:[%s8799_s7 + $0xd0] sm:$0xff]  ;;  %v6706_v14 = vld [vmem:[%s8799_s7 + $0x300] sm:$0xff] }
 0x11e   : > { %8045 = vmatprep.mubr.msk.f32.mxu0 %vm409_vm1, %v6670_v16  ;;  %v6708_v16 = vld [vmem:[%s8799_s7 + $0x320] sm:$0xff] }
 0x120   : > { %7654 = vmatmul.mubr.msk.f32.gmra.mrb[6].mxu1 %vm409_vm1, %v6283_v17  ;;  %v6714_v17 = vld [vmem:[%s8799_s7 + $0x390] sm:$0xff] }
 0x121   : > { %8046 = vmatmul.mubr.msk.f32.gmra.mrb[6].mxu0 %vm409_vm1, %v6671_v18  ;;  %7656 = vmatprep.mubr.msk.f32.mxu1 %vm409_vm1, %v9149_v28  ;;  %v6677_v28 = vld [vmem:[%s8799_s7 + $0xf0] sm:$0xff] }
 0x122   : > { %8048 = vmatprep.mubr.msk.f32.mxu0 %vm409_vm1, %v6672_v20  ;;  %v6716_v18 = vld [vmem:[%s8799_s7 + $0x3b0] sm:$0xff]  ;;  %v6722_v20 = vld [vmem:[%s8799_s7 + $0x420] sm:$0xff] }
 0x124   : > { %7657 = vmatmul.mubr.msk.f32.gmra.mrb[8].mxu1 %vm409_vm1, %v9153_v30  ;;  %v6678_v30 = vld [vmem:[%s8799_s7 + $0x100] sm:$0xff] }
 0x125   : > { %8049 = vmatmul.mubr.msk.f32.gmra.mrb[8].mxu0 %vm409_vm1, %v6673_v10  ;;  %7659 = vmatprep.mubr.msk.f32.mxu1 %vm409_vm1, %v9163_v32  ;;  %v6291_v32 = vld [vmem:[%s8794_s30 + $0x110] sm:$0xff] }
 0x126   : > { %8051 = vmatprep.mubr.msk.f32.mxu0 %vm409_vm1, %v6674_v22  ;;  %v6405_v10 = vld [vmem:[%s8794_s30 + $0x11] sm:$0xff] }
 0x127   : > { %v6793_v22 = vld [vmem:[%s8799_s7 + $0x11] sm:$0xff] }
 0x128   : > { %7660 = vmatmul.mubr.msk.f32.gmra.mrb[10].mxu1 %vm409_vm1, %v9167_v34  ;;  %v6679_v34 = vld [vmem:[%s8799_s7 + $0x110] sm:$0xff] }
 0x129   : > { %8052 = vmatmul.mubr.msk.f32.gmra.mrb[10].mxu0 %vm409_vm1, %v6675_v24  ;;  %7662 = vmatprep.mubr.msk.f32.mxu1 %vm409_vm1, %v9177_v36  ;;  %v6680_v36 = vld [vmem:[%s8799_s7 + $0x130] sm:$0xff] }
 0x12a   : > { %8054 = vmatprep.mubr.msk.f32.mxu0 %vm409_vm1, %v6676_v58  ;;  %v6407_v24 = vld [vmem:[%s8794_s30 + $0x31] sm:$0xff] }
 0x12b   : > { %v6795_v58 = vld [vmem:[%s8799_s7 + $0x31] sm:$0xff] }
 0x12c   : > { %7663 = vmatmul.mubr.msk.f32.gmra.mrb[12].mxu1 %vm409_vm1, %v9181_v38  ;;  %v6681_v38 = vld [vmem:[%s8799_s7 + $0x140] sm:$0xff] }
 0x12d   : > { %8055 = vmatmul.mubr.msk.f32.gmra.mrb[12].mxu0 %vm409_vm1, %v6677_v28  ;;  %7665 = vmatprep.mubr.msk.f32.mxu1 %vm409_vm1, %v9191_v40  ;;  %v6683_v40 = vld [vmem:[%s8799_s7 + $0x160] sm:$0xff] }
 0x12e   : > { %8057 = vmatprep.mubr.msk.f32.mxu0 %vm409_vm1, %v6678_v30  ;;  %v6408_v28 = vld [vmem:[%s8794_s30 + $0x41] sm:$0xff] }
 0x12f   : > { %v6796_v30 = vld [vmem:[%s8799_s7 + $0x41] sm:$0xff] }
 0x130   : > { %7666 = vmatmul.mubr.msk.f32.gmra.mrb[14].mxu1 %vm409_vm1, %v6291_v32  ;;  %v6409_v32 = vld [vmem:[%s8794_s30 + $0x51] sm:$0xff] }
 0x131   : > { %8058 = vmatmul.mubr.msk.f32.gmra.mrb[14].mxu0 %vm409_vm1, %v6679_v34  ;;  %7668 = vmatprep.mubr.msk.f32.mxu1 %vm409_vm1, %v9202_v44  ;;  %v6685_v44 = vld [vmem:[%s8799_s7 + $0x180] sm:$0xff]  ;;  %v6797_v34 = vld [vmem:[%s8799_s7 + $0x51] sm:$0xff] }
 0x132   : > { %8060 = vmatprep.mubr.msk.f32.mxu0 %vm409_vm1, %v6680_v36  ;;  %v6410_v36 = vld [vmem:[%s8794_s30 + $0x61] sm:$0xff] }
 0x134   : > { %7669 = vmatmul.mubr.msk.f32.gmra.mrb[16].mxu1 %vm409_vm1, %v9206_v46  ;;  %v6686_v46 = vld [vmem:[%s8799_s7 + $0x190] sm:$0xff] }
 0x135   : > { %8061 = vmatmul.mubr.msk.f32.gmra.mrb[16].mxu0 %vm409_vm1, %v6681_v38  ;;  %7671 = vmatprep.mubr.msk.f32.mxu1 %vm409_vm1, %v9216_v48  ;;  %v6299_v48 = vld [vmem:[%s8794_s30 + $0x1a0] sm:$0xff] }
 0x136   : > { %8063 = vmatprep.mubr.msk.f32.mxu0 %vm409_vm1, %v6682_v5  ;;  %v6798_v38 = vld [vmem:[%s8799_s7 + $0x61] sm:$0xff]  ;;  %v6411_v5 = vld [vmem:[%s8794_s30 + $0x71] sm:$0xff] }
 0x138   : > { %7672 = vmatmul.mubr.msk.f32.gmra.mrb[18].mxu1 %vm409_vm1, %v9220_v50  ;;  %v6687_v50 = vld [vmem:[%s8799_s7 + $0x1a0] sm:$0xff] }
 0x139   : > { %8064 = vmatmul.mubr.msk.f32.gmra.mrb[18].mxu0 %vm409_vm1, %v6683_v40  ;;  %7674 = vmatprep.mubr.msk.f32.mxu1 %vm409_vm1, %v9230_v52  ;;  %v6688_v52 = vld [vmem:[%s8799_s7 + $0x1c0] sm:$0xff]  ;;  %v6799_v40 = vld [vmem:[%s8799_s7 + $0x71] sm:$0xff] }
 0x13a   : > { %8066 = vmatprep.mubr.msk.f32.mxu0 %vm409_vm1, %v6684_v9  ;;  %v6412_v9 = vld [vmem:[%s8794_s30 + $0x81] sm:$0xff] }
 0x13c   : > { %7675 = vmatmul.mubr.msk.f32.gmra.mrb[20].mxu1 %vm409_vm1, %v9234_v54  ;;  %v6689_v54 = vld [vmem:[%s8799_s7 + $0x1d0] sm:$0xff] }
 0x13d   : > { %8067 = vmatmul.mubr.msk.f32.gmra.mrb[20].mxu0 %vm409_vm1, %v6685_v44  ;;  %7677 = vmatprep.mubr.msk.f32.mxu1 %vm409_vm1, %v9244_v56  ;;  %v6691_v56 = vld [vmem:[%s8799_s7 + $0x1f0] sm:$0xff]  ;;  %v6800_v44 = vld [vmem:[%s8799_s7 + $0x81] sm:$0xff] }
 0x13e   : > { %8069 = vmatprep.mubr.msk.f32.mxu0 %vm409_vm1, %v6686_v46  ;;  %v6413_v46 = vld [vmem:[%s8794_s30 + $0xa1] sm:$0xff] }
 0x140   : > { %7678 = vmatmul.mubr.msk.f32.gmra.mrb[22].mxu1 %vm409_vm1, %v6299_v48  ;;  %v6801_v48 = vld [vmem:[%s8799_s7 + $0xa1] sm:$0xff] }
 0x141   : > { %8070 = vmatmul.mubr.msk.f32.gmra.mrb[22].mxu0 %vm409_vm1, %v6687_v50  ;;  %7680 = vmatprep.mubr.msk.f32.mxu1 %vm409_vm1, %v9255_v60  ;;  %v6693_v60 = vld [vmem:[%s8799_s7 + $0x210] sm:$0xff] }
 0x142   : > { %8072 = vmatprep.mubr.msk.f32.mxu0 %vm409_vm1, %v6688_v52  ;;  %v6414_v50 = vld [vmem:[%s8794_s30 + $0xb1] sm:$0xff] }
 0x143   : > { %v6802_v52 = vld [vmem:[%s8799_s7 + $0xb1] sm:$0xff] }
 0x144   : > { %7681 = vmatmul.mubr.msk.f32.gmra.mrb[24].mxu1 %vm409_vm1, %v9259_v62  ;;  %v6694_v62 = vld [vmem:[%s8799_s7 + $0x220] sm:$0xff] }
 0x145   : > { %8073 = vmatmul.mubr.msk.f32.gmra.mrb[24].mxu0 %vm409_vm1, %v6689_v54  ;;  %7683 = vmatprep.mubr.msk.f32.mxu1 %vm409_vm1, %v9269_v0  ;;  %v6307_v0 = vld [vmem:[%s8794_s30 + $0x230] sm:$0xff]  ;;  %v6415_v54 = vld [vmem:[%s8794_s30 + $0xc1] sm:$0xff] }
 0x146   : > { %8075 = vmatprep.mubr.msk.f32.mxu0 %vm409_vm1, %v6690_v23  ;;  %v6803_v23 = vld [vmem:[%s8799_s7 + $0xc1] sm:$0xff] }
 0x148   : > { %7684 = vmatmul.mubr.msk.f32.gmra.mrb[26].mxu1 %vm409_vm1, %v9273_v2  ;;  %v6695_v2 = vld [vmem:[%s8799_s7 + $0x230] sm:$0xff] }
 0x149   : > { %8076 = vmatmul.mubr.msk.f32.gmra.mrb[26].mxu0 %vm409_vm1, %v6691_v56  ;;  %7686 = vmatprep.mubr.msk.f32.mxu1 %vm409_vm1, %v9283_v4  ;;  %v6696_v4 = vld [vmem:[%s8799_s7 + $0x250] sm:$0xff] }
 0x14a   : > { %8078 = vmatprep.mubr.msk.f32.mxu0 %vm409_vm1, %v6692_v37  ;;  %v6416_v56 = vld [vmem:[%s8794_s30 + $0xd1] sm:$0xff] }
 0x14b   : > { %v6804_v37 = vld [vmem:[%s8799_s7 + $0xd1] sm:$0xff] }
 0x14c   : > { %7687 = vmatmul.mubr.msk.f32.gmra.mrb[28].mxu1 %vm409_vm1, %v9287_v6  ;;  %v6697_v6 = vld [vmem:[%s8799_s7 + $0x260] sm:$0xff] }
 0x14d   : > { %8079 = vmatmul.mubr.msk.f32.gmra.mrb[28].mxu0 %vm409_vm1, %v6693_v60  ;;  %7689 = vmatprep.mubr.msk.f32.mxu1 %vm409_vm1, %v9297_v8  ;;  %v6699_v8 = vld [vmem:[%s8799_s7 + $0x280] sm:$0xff] }
 0x14e   : > { %8081 = vmatprep.mubr.msk.f32.mxu0 %vm409_vm1, %v6694_v62  ;;  %v6417_v60 = vld [vmem:[%s8794_s30 + $0xe1] sm:$0xff] }
 0x14f   : > { %v6805_v62 = vld [vmem:[%s8799_s7 + $0xe1] sm:$0xff] }
 0x150   : > { %7690 = vmatmul.mubr.msk.f32.gmra.mrb[30].mxu1 %vm409_vm1, %v6307_v0  ;;  %v6418_v0 = vld [vmem:[%s8794_s30 + $0xf1] sm:$0xff] }
 0x151   : > { %8082 = vmatmul.mubr.msk.f32.gmra.mrb[30].mxu0 %vm409_vm1, %v6695_v2  ;;  %7692 = vmatprep.mubr.msk.f32.mxu1 %vm409_vm1, %v9308_v19  ;;  %v6701_v19 = vld [vmem:[%s8799_s7 + $0x2a0] sm:$0xff]  ;;  %v6806_v2 = vld [vmem:[%s8799_s7 + $0xf1] sm:$0xff] }
 0x152   : > { %8084 = vmatprep.mubr.msk.f32.mxu0 %vm409_vm1, %v6696_v4  ;;  %v6419_v4 = vld [vmem:[%s8794_s30 + $0x101] sm:$0xff] }
 0x154   : > { %7693 = vmatmul.mubr.msk.f32.gmra.mrb[32].mxu1 %vm409_vm1, %v9312_v11  ;;  %v6702_v11 = vld [vmem:[%s8799_s7 + $0x2b0] sm:$0xff] }
 0x155   : > { %8085 = vmatmul.mubr.msk.f32.gmra.mrb[32].mxu0 %vm409_vm1, %v6697_v6  ;;  %7695 = vmatprep.mubr.msk.f32.mxu1 %vm409_vm1, %v9322_v25  ;;  %v6315_v25 = vld [vmem:[%s8794_s30 + $0x2c0] sm:$0xff] }
 0x156   : > { %8087 = vmatprep.mubr.msk.f32.mxu0 %vm409_vm1, %v6698_v12  ;;  %v6807_v6 = vld [vmem:[%s8799_s7 + $0x101] sm:$0xff]  ;;  %v6420_v12 = vld [vmem:[%s8794_s30 + $0x111] sm:$0xff] }
 0x158   : > { %7696 = vmatmul.mubr.msk.f32.gmra.mrb[34].mxu1 %vm409_vm1, %v9326_v27  ;;  %v6703_v27 = vld [vmem:[%s8799_s7 + $0x2c0] sm:$0xff] }
 0x159   : > { %8088 = vmatmul.mubr.msk.f32.gmra.mrb[34].mxu0 %vm409_vm1, %v6699_v8  ;;  %7698 = vmatprep.mubr.msk.f32.mxu1 %vm409_vm1, %v9336_v31  ;;  %v6704_v31 = vld [vmem:[%s8799_s7 + $0x2e0] sm:$0xff]  ;;  %v6808_v8 = vld [vmem:[%s8799_s7 + $0x111] sm:$0xff] }
 0x15a   : > { %8090 = vmatprep.mubr.msk.f32.mxu0 %vm409_vm1, %v6700_v47  ;;  %v6421_v47 = vld [vmem:[%s8794_s30 + $0x131] sm:$0xff] }
 0x15c   : > { %7699 = vmatmul.mubr.msk.f32.gmra.mrb[36].mxu1 %vm409_vm1, %v9340_v35  ;;  %v6705_v35 = vld [vmem:[%s8799_s7 + $0x2f0] sm:$0xff] }
 0x15d   : > { %8091 = vmatmul.mubr.msk.f32.gmra.mrb[36].mxu0 %vm409_vm1, %v6701_v19  ;;  %7701 = vmatprep.mubr.msk.f32.mxu1 %vm409_vm1, %v9350_v39  ;;  %v6707_v39 = vld [vmem:[%s8799_s7 + $0x310] sm:$0xff] }
 0x15e   : > { %8093 = vmatprep.mubr.msk.f32.mxu0 %vm409_vm1, %v6702_v11  ;;  %v6809_v19 = vld [vmem:[%s8799_s7 + $0x131] sm:$0xff]  ;;  %v6422_v11 = vld [vmem:[%s8794_s30 + $0x141] sm:$0xff] }
 0x160   : > { %7702 = vmatmul.mubr.msk.f32.gmra.mrb[38].mxu1 %vm409_vm1, %v6315_v25  ;;  %v6810_v25 = vld [vmem:[%s8799_s7 + $0x141] sm:$0xff] }
 0x161   : > { %8094 = vmatmul.mubr.msk.f32.gmra.mrb[38].mxu0 %vm409_vm1, %v6703_v27  ;;  %7704 = vmatprep.mubr.msk.f32.mxu1 %vm409_vm1, %v9361_v45  ;;  %v6709_v45 = vld [vmem:[%s8799_s7 + $0x330] sm:$0xff] }
 0x162   : > { %8096 = vmatprep.mubr.msk.f32.mxu0 %vm409_vm1, %v6704_v31  ;;  %v6423_v27 = vld [vmem:[%s8794_s30 + $0x151] sm:$0xff] }
 0x163   : > { %v6811_v31 = vld [vmem:[%s8799_s7 + $0x151] sm:$0xff] }
 0x164   : > { %7705 = vmatmul.mubr.msk.f32.gmra.mrb[40].mxu1 %vm409_vm1, %v9365_v49  ;;  %v6710_v49 = vld [vmem:[%s8799_s7 + $0x340] sm:$0xff] }
 0x165   : > { %8097 = vmatmul.mubr.msk.f32.gmra.mrb[40].mxu0 %vm409_vm1, %v6705_v35  ;;  %7707 = vmatprep.mubr.msk.f32.mxu1 %vm409_vm1, %v9375_v53  ;;  %v6323_v53 = vld [vmem:[%s8794_s30 + $0x350] sm:$0xff]  ;;  %v6424_v35 = vld [vmem:[%s8794_s30 + $0x161] sm:$0xff] }
 0x166   : > { %8099 = vmatprep.mubr.msk.f32.mxu0 %vm409_vm1, %v6706_v14  ;;  %v6812_v14 = vld [vmem:[%s8799_s7 + $0x161] sm:$0xff] }
 0x168   : > { %7708 = vmatmul.mubr.msk.f32.gmra.mrb[42].mxu1 %vm409_vm1, %v9379_v57  ;;  %v6711_v57 = vld [vmem:[%s8799_s7 + $0x350] sm:$0xff] }
 0x169   : > { %8100 = vmatmul.mubr.msk.f32.gmra.mrb[42].mxu0 %vm409_vm1, %v6707_v39  ;;  %7710 = vmatprep.mubr.msk.f32.mxu1 %vm409_vm1, %v9389_v59  ;;  %v6712_v59 = vld [vmem:[%s8799_s7 + $0x370] sm:$0xff] }
 0x16a   : > { %8102 = vmatprep.mubr.msk.f32.mxu0 %vm409_vm1, %v6708_v16  ;;  %v6425_v39 = vld [vmem:[%s8794_s30 + $0x171] sm:$0xff] }
 0x16b   : > { %v6813_v16 = vld [vmem:[%s8799_s7 + $0x171] sm:$0xff] }
 0x16c   : > { %7711 = vmatmul.mubr.msk.f32.gmra.mrb[44].mxu1 %vm409_vm1, %v9393_v63  ;;  %v6713_v63 = vld [vmem:[%s8799_s7 + $0x380] sm:$0xff] }
 0x16d   : > { %8103 = vmatmul.mubr.msk.f32.gmra.mrb[44].mxu0 %vm409_vm1, %v6709_v45  ;;  %7713 = vmatprep.mubr.msk.f32.mxu1 %vm409_vm1, %v9403_v3  ;;  %v6715_v3 = vld [vmem:[%s8799_s7 + $0x3a0] sm:$0xff] }
 0x16e   : > { %8105 = vmatprep.mubr.msk.f32.mxu0 %vm409_vm1, %v6710_v49  ;;  %v6426_v45 = vld [vmem:[%s8794_s30 + $0x181] sm:$0xff] }
 0x16f   : > { %v6814_v49 = vld [vmem:[%s8799_s7 + $0x181] sm:$0xff] }
 0x170   : > { %7714 = vmatmul.mubr.msk.f32.gmra.mrb[46].mxu1 %vm409_vm1, %v6323_v53  ;;  %v6427_v53 = vld [vmem:[%s8794_s30 + $0x191] sm:$0xff] }
 0x171   : > { %8106 = vmatmul.mubr.msk.f32.gmra.mrb[46].mxu0 %vm409_vm1, %v6711_v57  ;;  %7716 = vmatprep.mubr.msk.f32.mxu1 %vm409_vm1, %v9414_v13  ;;  %v6717_v13 = vld [vmem:[%s8799_s7 + $0x3c0] sm:$0xff]  ;;  %v6815_v57 = vld [vmem:[%s8799_s7 + $0x191] sm:$0xff] }
 0x172   : > { %8108 = vmatprep.mubr.msk.f32.mxu0 %vm409_vm1, %v6712_v59  ;;  %v6428_v59 = vld [vmem:[%s8794_s30 + $0x1a1] sm:$0xff] }
 0x174   : > { %7717 = vmatmul.mubr.msk.f32.gmra.mrb[48].mxu1 %vm409_vm1, %v9418_v21  ;;  %v6718_v21 = vld [vmem:[%s8799_s7 + $0x3d0] sm:$0xff] }
 0x175   : > { %8109 = vmatmul.mubr.msk.f32.gmra.mrb[48].mxu0 %vm409_vm1, %v6713_v63  ;;  %7719 = vmatprep.mubr.msk.f32.mxu1 %vm409_vm1, %v9428_v26  ;;  %v6331_v26 = vld [vmem:[%s8794_s30 + $0x3e0] sm:$0xff] }
 0x176   : > { %8111 = vmatprep.mubr.msk.f32.mxu0 %vm409_vm1, %v6714_v17  ;;  %v6816_v63 = vld [vmem:[%s8799_s7 + $0x1a1] sm:$0xff] }
 0x177   : > { %v6429_v17 = vld [vmem:[%s8794_s30 + $0x1c1] sm:$0xff] }
 0x178   : > { %7720 = vmatmul.mubr.msk.f32.gmra.mrb[50].mxu1 %vm409_vm1, %v9432_v33  ;;  %v6719_v33 = vld [vmem:[%s8799_s7 + $0x3e0] sm:$0xff] }
 0x179   : > { %8112 = vmatmul.mubr.msk.f32.gmra.mrb[50].mxu0 %vm409_vm1, %v6715_v3  ;;  %7722 = vmatprep.mubr.msk.f32.mxu1 %vm409_vm1, %v9442_v41  ;;  %v6720_v41 = vld [vmem:[%s8799_s7 + $0x400] sm:$0xff] }
 0x17a   : > { %8114 = vmatprep.mubr.msk.f32.mxu0 %vm409_vm1, %v6716_v18  ;;  %v6817_v3 = vld [vmem:[%s8799_s7 + $0x1c1] sm:$0xff]  ;;  %v6430_v18 = vld [vmem:[%s8794_s30 + $0x1d1] sm:$0xff] }
 0x17c   : > { %7723 = vmatmul.mubr.msk.f32.gmra.mrb[52].mxu1 %vm409_vm1, %v9446_v43  ;;  %v6721_v43 = vld [vmem:[%s8799_s7 + $0x410] sm:$0xff] }
 0x17d   : > { %8115 = vmatmul.mubr.msk.f32.gmra.mrb[52].mxu0 %vm409_vm1, %v6717_v13  ;;  %7725 = vmatprep.mubr.msk.f32.mxu1 %vm409_vm1, %v9456_v51  ;;  %v6723_v51 = vld [vmem:[%s8799_s7 + $0x430] sm:$0xff] }
 0x17e   : > { %8117 = vmatprep.mubr.msk.f32.mxu0 %vm409_vm1, %v6718_v21  ;;  %v6818_v13 = vld [vmem:[%s8799_s7 + $0x1d1] sm:$0xff]  ;;  %v6431_v21 = vld [vmem:[%s8794_s30 + $0x1e1] sm:$0xff] }
 0x180   : > { %7726 = vmatmul.mubr.msk.f32.gmra.mrb[54].mxu1 %vm409_vm1, %v6331_v26  ;;  %v6819_v26 = vld [vmem:[%s8799_s7 + $0x1e1] sm:$0xff] }
 0x181   : > { %8118 = vmatmul.mubr.msk.f32.gmra.mrb[54].mxu0 %vm409_vm1, %v6719_v33  ;;  %7728 = vmatprep.mubr.msk.f32.mxu1 %vm409_vm1, %v9467_v1  ;;  %v6724_v1 = vld [vmem:[%s8799_s7 + $0x440] sm:$0xff]  ;;  %v6432_v33 = vld [vmem:[%s8794_s30 + $0x1f1] sm:$0xff] }
 0x182   : > { %8120 = vmatprep.mubr.msk.f32.mxu0 %vm409_vm1, %v6720_v41  ;;  %v6820_v41 = vld [vmem:[%s8799_s7 + $0x1f1] sm:$0xff] }
 0x184   : > { %7729 = vmatmul.mubr.msk.f32.gmra.mrb[56].mxu1 %vm409_vm1, %v9471_v7  ;;  %v6725_v7 = vld [vmem:[%s8799_s7 + $0x450] sm:$0xff] }
 0x185   : > { %8121 = vmatmul.mubr.msk.f32.gmra.mrb[56].mxu0 %vm409_vm1, %v6721_v43  ;;  %7731 = vmatprep.mubr.msk.f32.mxu1 %vm409_vm1, %v9481_v15  ;;  %v6726_v15 = vld [vmem:[%s8799_s7 + $0x460] sm:$0xff] }
 0x186   : > { %8123 = vmatprep.mubr.msk.f32.mxu0 %vm409_vm1, %v6722_v20  ;;  %v6433_v43 = vld [vmem:[%s8794_s30 + $0x201] sm:$0xff] }
 0x187   : > { %v6821_v20 = vld [vmem:[%s8799_s7 + $0x201] sm:$0xff] }
 0x188   : > { %7732 = vmatmul.mubr.msk.f32.gmra.mrb[58].mxu1 %vm409_vm1, %v9485_v29  ;;  %v6339_v29 = vld [vmem:[%s8794_s30 + $0x470] sm:$0xff] }
 0x189   : > { %8124 = vmatmul.mubr.msk.f32.gmra.mrb[58].mxu0 %vm409_vm1, %v6723_v51  ;;  %7734 = vmatprep.mubr.msk.f32.mxu1 %vm409_vm1, %v9495_v42  ;;  %v6727_v42 = vld [vmem:[%s8799_s7 + $0x470] sm:$0xff] }
 0x18a   : > { %8126 = vmatprep.mubr.msk.f32.mxu0 %vm409_vm1, %v6724_v1  ;;  %v6434_v51 = vld [vmem:[%s8794_s30 + $0x211] sm:$0xff] }
 0x18b   : > { %v6822_v1 = vld [vmem:[%s8799_s7 + $0x211] sm:$0xff] }
 0x18c   : > { %7735 = vmatmul.mubr.msk.f32.gmra.mrb[60].mxu1 %vm409_vm1, %v9499_v55  ;;  %v6406_v55 = vld [vmem:[%s8794_s30 + $0x21] sm:$0xff] }
 0x18d   : > { %8127 = vmatmul.mubr.msk.f32.gmra.mrb[60].mxu0 %vm409_vm1, %v6725_v7  ;;  %7737 = vmatprep.mubr.msk.f32.mxu1 %vm409_vm1, %v9509_v61  ;;  %v6794_v61 = vld [vmem:[%s8799_s7 + $0x21] sm:$0xff] }
 0x18e   : > { %8129 = vmatprep.mubr.msk.f32.mxu0 %vm409_vm1, %v6726_v15  ;;  %v6435_v7 = vld [vmem:[%s8794_s30 + $0x221] sm:$0xff] }
 0x18f   : > { %v6823_v15 = vld [vmem:[%s8799_s7 + $0x221] sm:$0xff] }
 0x190   : > { %7738 = vmatmul.mubr.msk.f32.gmra.mrb[62].mxu1 %vm409_vm1, %v6339_v29  ;;  %v6436_v29 = vld [vmem:[%s8794_s30 + $0x231] sm:$0xff] }
 0x191   : > { %8130 = vmatmul.mubr.msk.f32.gmra.mrb[62].mxu0 %vm409_vm1, %v6727_v42  ;;  %7742 = vmatprep.mubr.msk.f32.mxu1 %vm409_vm1, %v6405_v10  ;;  %v6824_v42 = vld [vmem:[%s8799_s7 + $0x231] sm:$0xff] }
 0x192   : > { %8134 = vmatprep.mubr.msk.f32.mxu0 %vm409_vm1, %v6793_v22  ;;  %v6437_v10 = vld [vmem:[%s8794_s30 + $0x251] sm:$0xff] }
 0x193   : > { %v6825_v22 = vld [vmem:[%s8799_s7 + $0x251] sm:$0xff] }
 0x194   : > { %7743 = vmatmul.mubr.msk.f32.vlgmr.msra.gmra.mrb[0].mxu1 %vm409_vm1, %v6406_v55  ;;  %v6438_v55 = vld [vmem:[%s8794_s30 + $0x261] sm:$0xff] }
 0x195   : > { %8135 = vmatmul.mubr.msk.f32.vlgmr.msra.gmra.mrb[0].mxu0 %vm409_vm1, %v6794_v61  ;;  %7745 = vmatprep.mubr.msk.f32.mxu1 %vm409_vm1, %v6407_v24  ;;  %v6826_v61 = vld [vmem:[%s8799_s7 + $0x261] sm:$0xff]  ;;  %v6439_v24 = vld [vmem:[%s8794_s30 + $0x271] sm:$0xff] }
 0x196   : > { %8137 = vmatprep.mubr.msk.f32.mxu0 %vm409_vm1, %v6795_v58  ;;  %v6827_v58 = vld [vmem:[%s8799_s7 + $0x271] sm:$0xff] }
 0x198   : > { %7746 = vmatmul.mubr.msk.f32.gmra.mrb[2].mxu1 %vm409_vm1, %v6408_v28  ;;  %v6440_v28 = vld [vmem:[%s8794_s30 + $0x281] sm:$0xff] }
 0x199   : > { %8138 = vmatmul.mubr.msk.f32.gmra.mrb[2].mxu0 %vm409_vm1, %v6796_v30  ;;  %7748 = vmatprep.mubr.msk.f32.mxu1 %vm409_vm1, %v6409_v32  ;;  %v6828_v30 = vld [vmem:[%s8799_s7 + $0x281] sm:$0xff]  ;;  %v6441_v32 = vld [vmem:[%s8794_s30 + $0x291] sm:$0xff] }
 0x19a   : > { %8140 = vmatprep.mubr.msk.f32.mxu0 %vm409_vm1, %v6797_v34  ;;  %v6829_v34 = vld [vmem:[%s8799_s7 + $0x291] sm:$0xff] }
 0x19c   : > { %7749 = vmatmul.mubr.msk.f32.gmra.mrb[4].mxu1 %vm409_vm1, %v6410_v36  ;;  %v6442_v36 = vld [vmem:[%s8794_s30 + $0x2a1] sm:$0xff] }
 0x19d   : > { %8141 = vmatmul.mubr.msk.f32.gmra.mrb[4].mxu0 %vm409_vm1, %v6798_v38  ;;  %7751 = vmatprep.mubr.msk.f32.mxu1 %vm409_vm1, %v6411_v5  ;;  %v6830_v38 = vld [vmem:[%s8799_s7 + $0x2a1] sm:$0xff]  ;;  %v6443_v5 = vld [vmem:[%s8794_s30 + $0x2b1] sm:$0xff] }
 0x19e   : > { %8143 = vmatprep.mubr.msk.f32.mxu0 %vm409_vm1, %v6799_v40  ;;  %v6831_v40 = vld [vmem:[%s8799_s7 + $0x2b1] sm:$0xff] }
 0x1a0   : > { %7752 = vmatmul.mubr.msk.f32.gmra.mrb[6].mxu1 %vm409_vm1, %v6412_v9  ;;  %v6444_v9 = vld [vmem:[%s8794_s30 + $0x2c1] sm:$0xff] }
 0x1a1   : > { %8144 = vmatmul.mubr.msk.f32.gmra.mrb[6].mxu0 %vm409_vm1, %v6800_v44  ;;  %7754 = vmatprep.mubr.msk.f32.mxu1 %vm409_vm1, %v6413_v46  ;;  %v6832_v44 = vld [vmem:[%s8799_s7 + $0x2c1] sm:$0xff] }
 0x1a2   : > { %8146 = vmatprep.mubr.msk.f32.mxu0 %vm409_vm1, %v6801_v48  ;;  %v6445_v46 = vld [vmem:[%s8794_s30 + $0x2e1] sm:$0xff] }
 0x1a3   : > { %v6833_v48 = vld [vmem:[%s8799_s7 + $0x2e1] sm:$0xff] }
 0x1a4   : > { %7755 = vmatmul.mubr.msk.f32.gmra.mrb[8].mxu1 %vm409_vm1, %v6414_v50  ;;  %v6446_v50 = vld [vmem:[%s8794_s30 + $0x2f1] sm:$0xff] }
 0x1a5   : > { %8147 = vmatmul.mubr.msk.f32.gmra.mrb[8].mxu0 %vm409_vm1, %v6802_v52  ;;  %7757 = vmatprep.mubr.msk.f32.mxu1 %vm409_vm1, %v6415_v54  ;;  %v6834_v52 = vld [vmem:[%s8799_s7 + $0x2f1] sm:$0xff]  ;;  %v6447_v54 = vld [vmem:[%s8794_s30 + $0x301] sm:$0xff] }
 0x1a6   : > { %8149 = vmatprep.mubr.msk.f32.mxu0 %vm409_vm1, %v6803_v23  ;;  %v6835_v23 = vld [vmem:[%s8799_s7 + $0x301] sm:$0xff] }
 0x1a8   : > { %7758 = vmatmul.mubr.msk.f32.gmra.mrb[10].mxu1 %vm409_vm1, %v6416_v56  ;;  %v6448_v56 = vld [vmem:[%s8794_s30 + $0x311] sm:$0xff] }
 0x1a9   : > { %8150 = vmatmul.mubr.msk.f32.gmra.mrb[10].mxu0 %vm409_vm1, %v6804_v37  ;;  %7760 = vmatprep.mubr.msk.f32.mxu1 %vm409_vm1, %v6417_v60  ;;  %v6836_v37 = vld [vmem:[%s8799_s7 + $0x311] sm:$0xff]  ;;  %v6449_v60 = vld [vmem:[%s8794_s30 + $0x321] sm:$0xff] }
 0x1aa   : > { %8152 = vmatprep.mubr.msk.f32.mxu0 %vm409_vm1, %v6805_v62  ;;  %v6837_v62 = vld [vmem:[%s8799_s7 + $0x321] sm:$0xff] }
 0x1ac   : > { %7761 = vmatmul.mubr.msk.f32.gmra.mrb[12].mxu1 %vm409_vm1, %v6418_v0  ;;  %v6450_v0 = vld [vmem:[%s8794_s30 + $0x331] sm:$0xff] }
 0x1ad   : > { %8153 = vmatmul.mubr.msk.f32.gmra.mrb[12].mxu0 %vm409_vm1, %v6806_v2  ;;  %7763 = vmatprep.mubr.msk.f32.mxu1 %vm409_vm1, %v6419_v4  ;;  %v6838_v2 = vld [vmem:[%s8799_s7 + $0x331] sm:$0xff]  ;;  %v6451_v4 = vld [vmem:[%s8794_s30 + $0x341] sm:$0xff] }
 0x1ae   : > { %8155 = vmatprep.mubr.msk.f32.mxu0 %vm409_vm1, %v6807_v6  ;;  %v6839_v6 = vld [vmem:[%s8799_s7 + $0x341] sm:$0xff] }
 0x1b0   : > { %7764 = vmatmul.mubr.msk.f32.gmra.mrb[14].mxu1 %vm409_vm1, %v6420_v12  ;;  %v6452_v12 = vld [vmem:[%s8794_s30 + $0x351] sm:$0xff] }
 0x1b1   : > { %8156 = vmatmul.mubr.msk.f32.gmra.mrb[14].mxu0 %vm409_vm1, %v6808_v8  ;;  %7766 = vmatprep.mubr.msk.f32.mxu1 %vm409_vm1, %v6421_v47  ;;  %v6840_v8 = vld [vmem:[%s8799_s7 + $0x351] sm:$0xff] }
 0x1b2   : > { %8158 = vmatprep.mubr.msk.f32.mxu0 %vm409_vm1, %v6809_v19  ;;  %v6453_v47 = vld [vmem:[%s8794_s30 + $0x371] sm:$0xff] }
 0x1b3   : > { %v6841_v19 = vld [vmem:[%s8799_s7 + $0x371] sm:$0xff] }
 0x1b4   : > { %7767 = vmatmul.mubr.msk.f32.gmra.mrb[16].mxu1 %vm409_vm1, %v6422_v11  ;;  %v6454_v11 = vld [vmem:[%s8794_s30 + $0x381] sm:$0xff] }
 0x1b5   : > { %8159 = vmatmul.mubr.msk.f32.gmra.mrb[16].mxu0 %vm409_vm1, %v6810_v25  ;;  %7769 = vmatprep.mubr.msk.f32.mxu1 %vm409_vm1, %v6423_v27  ;;  %v6842_v25 = vld [vmem:[%s8799_s7 + $0x381] sm:$0xff]  ;;  %v6455_v27 = vld [vmem:[%s8794_s30 + $0x391] sm:$0xff] }
 0x1b6   : > { %8161 = vmatprep.mubr.msk.f32.mxu0 %vm409_vm1, %v6811_v31  ;;  %v6843_v31 = vld [vmem:[%s8799_s7 + $0x391] sm:$0xff] }
 0x1b8   : > { %7770 = vmatmul.mubr.msk.f32.gmra.mrb[18].mxu1 %vm409_vm1, %v6424_v35  ;;  %v6456_v35 = vld [vmem:[%s8794_s30 + $0x3a1] sm:$0xff] }
 0x1b9   : > { %8162 = vmatmul.mubr.msk.f32.gmra.mrb[18].mxu0 %vm409_vm1, %v6812_v14  ;;  %7772 = vmatprep.mubr.msk.f32.mxu1 %vm409_vm1, %v6425_v39  ;;  %v6844_v14 = vld [vmem:[%s8799_s7 + $0x3a1] sm:$0xff]  ;;  %v6457_v39 = vld [vmem:[%s8794_s30 + $0x3b1] sm:$0xff] }
 0x1ba   : > { %8164 = vmatprep.mubr.msk.f32.mxu0 %vm409_vm1, %v6813_v16  ;;  %v6845_v16 = vld [vmem:[%s8799_s7 + $0x3b1] sm:$0xff] }
 0x1bc   : > { %7773 = vmatmul.mubr.msk.f32.gmra.mrb[20].mxu1 %vm409_vm1, %v6426_v45  ;;  %v6458_v45 = vld [vmem:[%s8794_s30 + $0x3c1] sm:$0xff] }
 0x1bd   : > { %8165 = vmatmul.mubr.msk.f32.gmra.mrb[20].mxu0 %vm409_vm1, %v6814_v49  ;;  %7775 = vmatprep.mubr.msk.f32.mxu1 %vm409_vm1, %v6427_v53  ;;  %v6846_v49 = vld [vmem:[%s8799_s7 + $0x3c1] sm:$0xff]  ;;  %v6459_v53 = vld [vmem:[%s8794_s30 + $0x3d1] sm:$0xff] }
 0x1be   : > { %8167 = vmatprep.mubr.msk.f32.mxu0 %vm409_vm1, %v6815_v57  ;;  %v6847_v57 = vld [vmem:[%s8799_s7 + $0x3d1] sm:$0xff] }
 0x1c0   : > { %7776 = vmatmul.mubr.msk.f32.gmra.mrb[22].mxu1 %vm409_vm1, %v6428_v59  ;;  %v6460_v59 = vld [vmem:[%s8794_s30 + $0x3e1] sm:$0xff] }
 0x1c1   : > { %8168 = vmatmul.mubr.msk.f32.gmra.mrb[22].mxu0 %vm409_vm1, %v6816_v63  ;;  %7778 = vmatprep.mubr.msk.f32.mxu1 %vm409_vm1, %v6429_v17  ;;  %v6848_v63 = vld [vmem:[%s8799_s7 + $0x3e1] sm:$0xff] }
 0x1c2   : > { %8170 = vmatprep.mubr.msk.f32.mxu0 %vm409_vm1, %v6817_v3  ;;  %v6461_v17 = vld [vmem:[%s8794_s30 + $0x401] sm:$0xff] }
 0x1c3   : > { %v6849_v3 = vld [vmem:[%s8799_s7 + $0x401] sm:$0xff] }
 0x1c4   : > { %7779 = vmatmul.mubr.msk.f32.gmra.mrb[24].mxu1 %vm409_vm1, %v6430_v18  ;;  %v6462_v18 = vld [vmem:[%s8794_s30 + $0x411] sm:$0xff] }
 0x1c5   : > { %8171 = vmatmul.mubr.msk.f32.gmra.mrb[24].mxu0 %vm409_vm1, %v6818_v13  ;;  %7781 = vmatprep.mubr.msk.f32.mxu1 %vm409_vm1, %v6431_v21  ;;  %v6850_v13 = vld [vmem:[%s8799_s7 + $0x411] sm:$0xff]  ;;  %v6463_v21 = vld [vmem:[%s8794_s30 + $0x421] sm:$0xff] }
 0x1c6   : > { %8173 = vmatprep.mubr.msk.f32.mxu0 %vm409_vm1, %v6819_v26  ;;  %v6851_v26 = vld [vmem:[%s8799_s7 + $0x421] sm:$0xff] }
 0x1c8   : > { %7782 = vmatmul.mubr.msk.f32.gmra.mrb[26].mxu1 %vm409_vm1, %v6432_v33  ;;  %v6464_v33 = vld [vmem:[%s8794_s30 + $0x431] sm:$0xff] }
 0x1c9   : > { %8174 = vmatmul.mubr.msk.f32.gmra.mrb[26].mxu0 %vm409_vm1, %v6820_v41  ;;  %7784 = vmatprep.mubr.msk.f32.mxu1 %vm409_vm1, %v6433_v43  ;;  %v6852_v41 = vld [vmem:[%s8799_s7 + $0x431] sm:$0xff]  ;;  %v6465_v43 = vld [vmem:[%s8794_s30 + $0x441] sm:$0xff] }
 0x1ca   : > { %8176 = vmatprep.mubr.msk.f32.mxu0 %vm409_vm1, %v6821_v20  ;;  %v6853_v20 = vld [vmem:[%s8799_s7 + $0x441] sm:$0xff] }
 0x1cc   : > { %7785 = vmatmul.mubr.msk.f32.gmra.mrb[28].mxu1 %vm409_vm1, %v6434_v51  ;;  %v6466_v51 = vld [vmem:[%s8794_s30 + $0x451] sm:$0xff] }
 0x1cd   : > { %8177 = vmatmul.mubr.msk.f32.gmra.mrb[28].mxu0 %vm409_vm1, %v6822_v1  ;;  %7787 = vmatprep.mubr.msk.f32.mxu1 %vm409_vm1, %v6435_v7  ;;  %v6854_v1 = vld [vmem:[%s8799_s7 + $0x451] sm:$0xff]  ;;  %v6467_v7 = vld [vmem:[%s8794_s30 + $0x461] sm:$0xff] }
 0x1ce   : > { %8179 = vmatprep.mubr.msk.f32.mxu0 %vm409_vm1, %v6823_v15  ;;  %v6855_v15 = vld [vmem:[%s8799_s7 + $0x461] sm:$0xff] }
 0x1d0   : > { %7788 = vmatmul.mubr.msk.f32.gmra.mrb[30].mxu1 %vm409_vm1, %v6436_v29  ;;  %v6468_v29 = vld [vmem:[%s8794_s30 + $0x471] sm:$0xff] }
 0x1d1   : > { %8180 = vmatmul.mubr.msk.f32.gmra.mrb[30].mxu0 %vm409_vm1, %v6824_v42  ;;  %7790 = vmatprep.mubr.msk.f32.mxu1 %vm409_vm1, %v6437_v10  ;;  %v6856_v42 = vld [vmem:[%s8799_s7 + $0x471] sm:$0xff] }
 0x1d2   : > { %8182 = vmatprep.mubr.msk.f32.mxu0 %vm409_vm1, %v6825_v22 }
 0x1d4   : > { %7791 = vmatmul.mubr.msk.f32.gmra.mrb[32].mxu1 %vm409_vm1, %v6438_v55  ;;  %v10034_v55 = vld [vmem:[%s10182_s3] ss:$0 sm:$0xff] }
 0x1d5   : > { %8183 = vmatmul.mubr.msk.f32.gmra.mrb[32].mxu0 %vm409_vm1, %v6826_v61  ;;  %7793 = vmatprep.mubr.msk.f32.mxu1 %vm409_vm1, %v6439_v24 }
 0x1d6   : > { %8185 = vmatprep.mubr.msk.f32.mxu0 %vm409_vm1, %v6827_v58 }
 0x1d8   : > { %7794 = vmatmul.mubr.msk.f32.gmra.mrb[34].mxu1 %vm409_vm1, %v6440_v28 }
 0x1d9   : > { %8186 = vmatmul.mubr.msk.f32.gmra.mrb[34].mxu0 %vm409_vm1, %v6828_v30  ;;  %7796 = vmatprep.mubr.msk.f32.mxu1 %vm409_vm1, %v6441_v32 }
 0x1da   : > { %8188 = vmatprep.mubr.msk.f32.mxu0 %vm409_vm1, %v6829_v34 }
 0x1dc   : > { %7797 = vmatmul.mubr.msk.f32.gmra.mrb[36].mxu1 %vm409_vm1, %v6442_v36 }
 0x1dd   : > { %8189 = vmatmul.mubr.msk.f32.gmra.mrb[36].mxu0 %vm409_vm1, %v6830_v38  ;;  %7799 = vmatprep.mubr.msk.f32.mxu1 %vm409_vm1, %v6443_v5 }
 0x1de   : > { %8191 = vmatprep.mubr.msk.f32.mxu0 %vm409_vm1, %v6831_v40 }
 0x1e0   : > { %7800 = vmatmul.mubr.msk.f32.gmra.mrb[38].mxu1 %vm409_vm1, %v6444_v9 }
 0x1e1   : > { %8192 = vmatmul.mubr.msk.f32.gmra.mrb[38].mxu0 %vm409_vm1, %v6832_v44  ;;  %7802 = vmatprep.mubr.msk.f32.mxu1 %vm409_vm1, %v6445_v46 }
 0x1e2   : > { %8194 = vmatprep.mubr.msk.f32.mxu0 %vm409_vm1, %v6833_v48 }
 0x1e4   : > { %7803 = vmatmul.mubr.msk.f32.gmra.mrb[40].mxu1 %vm409_vm1, %v6446_v50 }
 0x1e5   : > { %8195 = vmatmul.mubr.msk.f32.gmra.mrb[40].mxu0 %vm409_vm1, %v6834_v52  ;;  %7805 = vmatprep.mubr.msk.f32.mxu1 %vm409_vm1, %v6447_v54 }
 0x1e6   : > { %8197 = vmatprep.mubr.msk.f32.mxu0 %vm409_vm1, %v6835_v23 }
 0x1e8   : > { %7806 = vmatmul.mubr.msk.f32.gmra.mrb[42].mxu1 %vm409_vm1, %v6448_v56 }
 0x1e9   : > { %8198 = vmatmul.mubr.msk.f32.gmra.mrb[42].mxu0 %vm409_vm1, %v6836_v37  ;;  %7808 = vmatprep.mubr.msk.f32.mxu1 %vm409_vm1, %v6449_v60 }
 0x1ea   : > { %8200 = vmatprep.mubr.msk.f32.mxu0 %vm409_vm1, %v6837_v62 }
 0x1ec   : > { %7809 = vmatmul.mubr.msk.f32.gmra.mrb[44].mxu1 %vm409_vm1, %v6450_v0 }
 0x1ed   : > { %8201 = vmatmul.mubr.msk.f32.gmra.mrb[44].mxu0 %vm409_vm1, %v6838_v2  ;;  %7811 = vmatprep.mubr.msk.f32.mxu1 %vm409_vm1, %v6451_v4 }
 0x1ee   : > { %8203 = vmatprep.mubr.msk.f32.mxu0 %vm409_vm1, %v6839_v6 }
 0x1f0   : > { %7812 = vmatmul.mubr.msk.f32.gmra.mrb[46].mxu1 %vm409_vm1, %v6452_v12 }
 0x1f1   : > { %8204 = vmatmul.mubr.msk.f32.gmra.mrb[46].mxu0 %vm409_vm1, %v6840_v8  ;;  %7814 = vmatprep.mubr.msk.f32.mxu1 %vm409_vm1, %v6453_v47 }
 0x1f2   : > { %8206 = vmatprep.mubr.msk.f32.mxu0 %vm409_vm1, %v6841_v19 }
 0x1f4   : > { %7815 = vmatmul.mubr.msk.f32.gmra.mrb[48].mxu1 %vm409_vm1, %v6454_v11 }
 0x1f5   : > { %8207 = vmatmul.mubr.msk.f32.gmra.mrb[48].mxu0 %vm409_vm1, %v6842_v25  ;;  %7817 = vmatprep.mubr.msk.f32.mxu1 %vm409_vm1, %v6455_v27 }
 0x1f6   : > { %8209 = vmatprep.mubr.msk.f32.mxu0 %vm409_vm1, %v6843_v31 }
 0x1f8   : > { %7818 = vmatmul.mubr.msk.f32.gmra.mrb[50].mxu1 %vm409_vm1, %v6456_v35 }
 0x1f9   : > { %8210 = vmatmul.mubr.msk.f32.gmra.mrb[50].mxu0 %vm409_vm1, %v6844_v14  ;;  %7820 = vmatprep.mubr.msk.f32.mxu1 %vm409_vm1, %v6457_v39 }
 0x1fa   : > { %8212 = vmatprep.mubr.msk.f32.mxu0 %vm409_vm1, %v6845_v16 }
 0x1fc   : > { %7821 = vmatmul.mubr.msk.f32.gmra.mrb[52].mxu1 %vm409_vm1, %v6458_v45 }
 0x1fd   : > { %8213 = vmatmul.mubr.msk.f32.gmra.mrb[52].mxu0 %vm409_vm1, %v6846_v49  ;;  %7823 = vmatprep.mubr.msk.f32.mxu1 %vm409_vm1, %v6459_v53 }
 0x1fe   : > { %8215 = vmatprep.mubr.msk.f32.mxu0 %vm409_vm1, %v6847_v57 }
 0x200   : > { %7824 = vmatmul.mubr.msk.f32.gmra.mrb[54].mxu1 %vm409_vm1, %v6460_v59 }
 0x201   : > { %8216 = vmatmul.mubr.msk.f32.gmra.mrb[54].mxu0 %vm409_vm1, %v6848_v63  ;;  %7826 = vmatprep.mubr.msk.f32.mxu1 %vm409_vm1, %v6461_v17 }
 0x202   : > { %8218 = vmatprep.mubr.msk.f32.mxu0 %vm409_vm1, %v6849_v3 }
 0x204   : > { %7827 = vmatmul.mubr.msk.f32.gmra.mrb[56].mxu1 %vm409_vm1, %v6462_v18 }
 0x205   : > { %8219 = vmatmul.mubr.msk.f32.gmra.mrb[56].mxu0 %vm409_vm1, %v6850_v13  ;;  %7829 = vmatprep.mubr.msk.f32.mxu1 %vm409_vm1, %v6463_v21 }
 0x206   : > { %8221 = vmatprep.mubr.msk.f32.mxu0 %vm409_vm1, %v6851_v26 }
 0x208   : > { %7830 = vmatmul.mubr.msk.f32.gmra.mrb[58].mxu1 %vm409_vm1, %v6464_v33 }
 0x209   : > { %8222 = vmatmul.mubr.msk.f32.gmra.mrb[58].mxu0 %vm409_vm1, %v6852_v41  ;;  %7832 = vmatprep.mubr.msk.f32.mxu1 %vm409_vm1, %v6465_v43 }
 0x20a   : > { %8224 = vmatprep.mubr.msk.f32.mxu0 %vm409_vm1, %v6853_v20 }
 0x20c   : > { %7833 = vmatmul.mubr.msk.f32.gmra.mrb[60].mxu1 %vm409_vm1, %v6466_v51 }
 0x20d   : > { %8225 = vmatmul.mubr.msk.f32.gmra.mrb[60].mxu0 %vm409_vm1, %v6854_v1  ;;  %7835 = vmatprep.mubr.msk.f32.mxu1 %vm409_vm1, %v6467_v7 }
 0x20e   : > { %8227 = vmatprep.mubr.msk.f32.mxu0 %vm409_vm1, %v6855_v15 }
 0x210   : > { %7836 = vmatmul.mubr.msk.f32.gmra.mrb[62].mxu1 %vm409_vm1, %v6468_v29 }
 0x211   : > { %8228 = vmatmul.mubr.msk.f32.gmra.mrb[62].mxu0 %vm409_vm1, %v6856_v42 }
 0x267   : > { %v7744_v10 = vpop.f32.mrb[0].mxu1 }
 0x268   : > { %v8136_v22 = vpop.f32.mrb[0].mxu0  ;;  %v2607_v24 = vpop.f32.mrb[1].mxu1 }
 0x269   : > { %v8230_v61 = vadd.f32 %v8136_v22, %v7744_v10  ;;  %v5444_v58 = vpop.f32.mrb[1].mxu0 }
 0x26a   : > { %v8231_v28 = vadd.f32 %v5444_v58, %v2607_v24 }
 0x26b   : > { %v5835_v30 = vadd.f32 %v8230_v61, %v10034_v55  ;;  %v7747_v34 = vpop.f32.mrb[2].mxu1 }
 0x26c   : > { %v5834_v32 = vadd.f32 %v8231_v28, %v10034_v55  ;;  %v8139_v36 = vpop.f32.mrb[2].mxu0  ;;  %v2617_v40 = vpop.f32.mrb[3].mxu1 }
 0x26d   : > { %v5899_v38 = vmax.f32 %v5835_v30, 0.0  ;;  %v8232_v5 = vadd.f32 %v8139_v36, %v7747_v34  ;;  %v5454_v9 = vpop.f32.mrb[3].mxu0 }
 0x26e   : > { %v5898_v44 = vmax.f32 %v5834_v32, 0.0  ;;  %v8233_v46 = vadd.f32 %v5454_v9, %v2617_v40 }
 0x26f   : > { %5963 = vst [vmem:[%s10041_s25 + $0x8] sm:$0xff] %v5899_v38  ;;  %v5837_v48 = vadd.f32 %v8232_v5, %v10034_v55  ;;  %v7750_v52 = vpop.f32.mrb[4].mxu1 }
 0x270   : > { %5962 = vst [vmem:[%s10041_s25] sm:$0xff] %v5898_v44  ;;  %v5836_v50 = vadd.f32 %v8233_v46, %v10034_v55  ;;  %v8142_v54 = vpop.f32.mrb[4].mxu0  ;;  %v2627_v37 = vpop.f32.mrb[5].mxu1 }
 0x271   : > { %v5901_v23 = vmax.f32 %v5837_v48, 0.0  ;;  %v8234_v56 = vadd.f32 %v8142_v54, %v7750_v52  ;;  %v5464_v60 = vpop.f32.mrb[5].mxu0 }
 0x272   : > { %v5900_v62 = vmax.f32 %v5836_v50, 0.0  ;;  %v8235_v0 = vadd.f32 %v5464_v60, %v2627_v37 }
 0x273   : > { %5965 = vst [vmem:[%s10041_s25 + $0x18] sm:$0xff] %v5901_v23  ;;  %v5839_v2 = vadd.f32 %v8234_v56, %v10034_v55  ;;  %v7753_v6 = vpop.f32.mrb[6].mxu1 }
 0x274   : > { %5964 = vst [vmem:[%s10041_s25 + $0x10] sm:$0xff] %v5900_v62  ;;  %v5838_v4 = vadd.f32 %v8235_v0, %v10034_v55  ;;  %v8145_v12 = vpop.f32.mrb[6].mxu0  ;;  %v2637_v19 = vpop.f32.mrb[7].mxu1 }
 0x275   : > { %v5903_v8 = vmax.f32 %v5839_v2, 0.0  ;;  %v8236_v47 = vadd.f32 %v8145_v12, %v7753_v6  ;;  %v5474_v11 = vpop.f32.mrb[7].mxu0 }
 0x276   : > { %v5902_v25 = vmax.f32 %v5838_v4, 0.0  ;;  %v8237_v27 = vadd.f32 %v5474_v11, %v2637_v19 }
 0x277   : > { %5967 = vst [vmem:[%s10041_s25 + $0x28] sm:$0xff] %v5903_v8  ;;  %v5841_v31 = vadd.f32 %v8236_v47, %v10034_v55  ;;  %v7756_v14 = vpop.f32.mrb[8].mxu1 }
 0x278   : > { %5966 = vst [vmem:[%s10041_s25 + $0x20] sm:$0xff] %v5902_v25  ;;  %v5840_v35 = vadd.f32 %v8237_v27, %v10034_v55  ;;  %v8148_v39 = vpop.f32.mrb[8].mxu0  ;;  %v2647_v49 = vpop.f32.mrb[9].mxu1 }
 0x279   : > { %v5905_v16 = vmax.f32 %v5841_v31, 0.0  ;;  %v8238_v45 = vadd.f32 %v8148_v39, %v7756_v14  ;;  %v5484_v53 = vpop.f32.mrb[9].mxu0 }
 0x27a   : > { %v5904_v57 = vmax.f32 %v5840_v35, 0.0  ;;  %v8239_v59 = vadd.f32 %v5484_v53, %v2647_v49 }
 0x27b   : > { %5969 = vst [vmem:[%s10041_s25 + $0x38] sm:$0xff] %v5905_v16  ;;  %v5843_v63 = vadd.f32 %v8238_v45, %v10034_v55  ;;  %v7759_v3 = vpop.f32.mrb[10].mxu1 }
 0x27c   : > { %5968 = vst [vmem:[%s10041_s25 + $0x30] sm:$0xff] %v5904_v57  ;;  %v5842_v17 = vadd.f32 %v8239_v59, %v10034_v55  ;;  %v8151_v18 = vpop.f32.mrb[10].mxu0  ;;  %v2657_v26 = vpop.f32.mrb[11].mxu1 }
 0x27d   : > { %v5907_v13 = vmax.f32 %v5843_v63, 0.0  ;;  %v8240_v21 = vadd.f32 %v8151_v18, %v7759_v3  ;;  %v5494_v33 = vpop.f32.mrb[11].mxu0 }
 0x27e   : > { %v5906_v41 = vmax.f32 %v5842_v17, 0.0  ;;  %v8241_v43 = vadd.f32 %v5494_v33, %v2657_v26 }
 0x27f   : > { %5971 = vst [vmem:[%s10041_s25 + $0x48] sm:$0xff] %v5907_v13  ;;  %v5845_v20 = vadd.f32 %v8240_v21, %v10034_v55  ;;  %v7762_v1 = vpop.f32.mrb[12].mxu1 }
 0x280   : > { %5970 = vst [vmem:[%s10041_s25 + $0x40] sm:$0xff] %v5906_v41  ;;  %v5844_v51 = vadd.f32 %v8241_v43, %v10034_v55  ;;  %v8154_v7 = vpop.f32.mrb[12].mxu0  ;;  %v2667_v42 = vpop.f32.mrb[13].mxu1 }
 0x281   : > { %v5909_v15 = vmax.f32 %v5845_v20, 0.0  ;;  %v8242_v29 = vadd.f32 %v8154_v7, %v7762_v1  ;;  %v5504_v10 = vpop.f32.mrb[13].mxu0 }
 0x282   : > { %v5908_v22 = vmax.f32 %v5844_v51, 0.0  ;;  %v8243_v61 = vadd.f32 %v5504_v10, %v2667_v42 }
 0x283   : > { %5973 = vst [vmem:[%s10041_s25 + $0x58] sm:$0xff] %v5909_v15  ;;  %v5847_v24 = vadd.f32 %v8242_v29, %v10034_v55  ;;  %v7765_v28 = vpop.f32.mrb[14].mxu1 }
 0x284   : > { %5972 = vst [vmem:[%s10041_s25 + $0x50] sm:$0xff] %v5908_v22  ;;  %v5846_v58 = vadd.f32 %v8243_v61, %v10034_v55  ;;  %v8157_v30 = vpop.f32.mrb[14].mxu0  ;;  %v2677_v36 = vpop.f32.mrb[15].mxu1 }
 0x285   : > { %v5911_v32 = vmax.f32 %v5847_v24, 0.0  ;;  %v8244_v34 = vadd.f32 %v8157_v30, %v7765_v28  ;;  %v5514_v38 = vpop.f32.mrb[15].mxu0 }
 0x286   : > { %v5910_v5 = vmax.f32 %v5846_v58, 0.0  ;;  %v8245_v40 = vadd.f32 %v5514_v38, %v2677_v36 }
 0x287   : > { %5975 = vst [vmem:[%s10041_s25 + $0x68] sm:$0xff] %v5911_v32  ;;  %v5849_v9 = vadd.f32 %v8244_v34, %v10034_v55  ;;  %v7768_v46 = vpop.f32.mrb[16].mxu1 }
 0x288   : > { %5974 = vst [vmem:[%s10041_s25 + $0x60] sm:$0xff] %v5910_v5  ;;  %v5848_v44 = vadd.f32 %v8245_v40, %v10034_v55  ;;  %v8160_v48 = vpop.f32.mrb[16].mxu0  ;;  %v2687_v54 = vpop.f32.mrb[17].mxu1 }
 0x289   : > { %v5913_v50 = vmax.f32 %v5849_v9, 0.0  ;;  %v8246_v52 = vadd.f32 %v8160_v48, %v7768_v46  ;;  %v5524_v23 = vpop.f32.mrb[17].mxu0 }
 0x28a   : > { %v5912_v56 = vmax.f32 %v5848_v44, 0.0  ;;  %v8247_v37 = vadd.f32 %v5524_v23, %v2687_v54 }
 0x28b   : > { %5977 = vst [vmem:[%s10041_s25 + $0x78] sm:$0xff] %v5913_v50  ;;  %v5851_v60 = vadd.f32 %v8246_v52, %v10034_v55  ;;  %v7771_v0 = vpop.f32.mrb[18].mxu1 }
 0x28c   : > { %5976 = vst [vmem:[%s10041_s25 + $0x70] sm:$0xff] %v5912_v56  ;;  %v5850_v62 = vadd.f32 %v8247_v37, %v10034_v55  ;;  %v8163_v2 = vpop.f32.mrb[18].mxu0  ;;  %v2697_v12 = vpop.f32.mrb[19].mxu1 }
 0x28d   : > { %v5915_v4 = vmax.f32 %v5851_v60, 0.0  ;;  %v8248_v6 = vadd.f32 %v8163_v2, %v7771_v0  ;;  %v5534_v8 = vpop.f32.mrb[19].mxu0 }
 0x28e   : > { %v5914_v47 = vmax.f32 %v5850_v62, 0.0  ;;  %v8249_v19 = vadd.f32 %v5534_v8, %v2697_v12 }
 0x28f   : > { %5979 = vst [vmem:[%s10041_s25 + $0x88] sm:$0xff] %v5915_v4  ;;  %v5853_v11 = vadd.f32 %v8248_v6, %v10034_v55  ;;  %v7774_v27 = vpop.f32.mrb[20].mxu1 }
 0x290   : > { %5978 = vst [vmem:[%s10041_s25 + $0x80] sm:$0xff] %v5914_v47  ;;  %v5852_v25 = vadd.f32 %v8249_v19, %v10034_v55  ;;  %v8166_v31 = vpop.f32.mrb[20].mxu0  ;;  %v2707_v39 = vpop.f32.mrb[21].mxu1 }
 0x291   : > { %v5917_v35 = vmax.f32 %v5853_v11, 0.0  ;;  %v8250_v14 = vadd.f32 %v8166_v31, %v7774_v27  ;;  %v5544_v16 = vpop.f32.mrb[21].mxu0 }
 0x292   : > { %v5916_v45 = vmax.f32 %v5852_v25, 0.0  ;;  %v8251_v49 = vadd.f32 %v5544_v16, %v2707_v39 }
 0x293   : > { %5981 = vst [vmem:[%s10041_s25 + $0x98] sm:$0xff] %v5917_v35  ;;  %v5855_v53 = vadd.f32 %v8250_v14, %v10034_v55  ;;  %v7777_v59 = vpop.f32.mrb[22].mxu1 }
 0x294   : > { %5980 = vst [vmem:[%s10041_s25 + $0x90] sm:$0xff] %v5916_v45  ;;  %v5854_v57 = vadd.f32 %v8251_v49, %v10034_v55  ;;  %v8169_v63 = vpop.f32.mrb[22].mxu0  ;;  %v2717_v18 = vpop.f32.mrb[23].mxu1 }
 0x295   : > { %v5919_v17 = vmax.f32 %v5855_v53, 0.0  ;;  %v8252_v3 = vadd.f32 %v8169_v63, %v7777_v59  ;;  %v5554_v13 = vpop.f32.mrb[23].mxu0 }
 0x296   : > { %v5918_v21 = vmax.f32 %v5854_v57, 0.0  ;;  %v8253_v26 = vadd.f32 %v5554_v13, %v2717_v18 }
 0x297   : > { %5983 = vst [vmem:[%s10041_s25 + $0xa8] sm:$0xff] %v5919_v17  ;;  %v5857_v33 = vadd.f32 %v8252_v3, %v10034_v55  ;;  %v7780_v43 = vpop.f32.mrb[24].mxu1 }
 0x298   : > { %5982 = vst [vmem:[%s10041_s25 + $0xa0] sm:$0xff] %v5918_v21  ;;  %v5856_v41 = vadd.f32 %v8253_v26, %v10034_v55  ;;  %v8172_v20 = vpop.f32.mrb[24].mxu0  ;;  %v2727_v7 = vpop.f32.mrb[25].mxu1 }
 0x299   : > { %v5921_v51 = vmax.f32 %v5857_v33, 0.0  ;;  %v8254_v1 = vadd.f32 %v8172_v20, %v7780_v43  ;;  %v5564_v15 = vpop.f32.mrb[25].mxu0 }
 0x29a   : > { %v5920_v29 = vmax.f32 %v5856_v41, 0.0  ;;  %v8255_v42 = vadd.f32 %v5564_v15, %v2727_v7 }
 0x29b   : > { %5985 = vst [vmem:[%s10041_s25 + $0xb8] sm:$0xff] %v5921_v51  ;;  %v5859_v10 = vadd.f32 %v8254_v1, %v10034_v55  ;;  %v7783_v61 = vpop.f32.mrb[26].mxu1 }
 0x29c   : > { %5984 = vst [vmem:[%s10041_s25 + $0xb0] sm:$0xff] %v5920_v29  ;;  %v5858_v22 = vadd.f32 %v8255_v42, %v10034_v55  ;;  %v8175_v24 = vpop.f32.mrb[26].mxu0  ;;  %v2737_v30 = vpop.f32.mrb[27].mxu1 }
 0x29d   : > { %v5923_v58 = vmax.f32 %v5859_v10, 0.0  ;;  %v8256_v28 = vadd.f32 %v8175_v24, %v7783_v61  ;;  %v5574_v32 = vpop.f32.mrb[27].mxu0 }
 0x29e   : > { %v5922_v34 = vmax.f32 %v5858_v22, 0.0  ;;  %v8257_v36 = vadd.f32 %v5574_v32, %v2737_v30 }
 0x29f   : > { %5987 = vst [vmem:[%s10041_s25 + $0xc8] sm:$0xff] %v5923_v58  ;;  %v5861_v38 = vadd.f32 %v8256_v28, %v10034_v55  ;;  %v7786_v40 = vpop.f32.mrb[28].mxu1 }
 0x2a0   : > { %5986 = vst [vmem:[%s10041_s25 + $0xc0] sm:$0xff] %v5922_v34  ;;  %v5860_v5 = vadd.f32 %v8257_v36, %v10034_v55  ;;  %v8178_v9 = vpop.f32.mrb[28].mxu0  ;;  %v2747_v48 = vpop.f32.mrb[29].mxu1 }
 0x2a1   : > { %v5925_v44 = vmax.f32 %v5861_v38, 0.0  ;;  %v8258_v46 = vadd.f32 %v8178_v9, %v7786_v40  ;;  %v5584_v50 = vpop.f32.mrb[29].mxu0 }
 0x2a2   : > { %v5924_v52 = vmax.f32 %v5860_v5, 0.0  ;;  %v8259_v54 = vadd.f32 %v5584_v50, %v2747_v48 }
 0x2a3   : > { %5989 = vst [vmem:[%s10041_s25 + $0xd8] sm:$0xff] %v5925_v44  ;;  %v5863_v23 = vadd.f32 %v8258_v46, %v10034_v55  ;;  %v7789_v37 = vpop.f32.mrb[30].mxu1 }
 0x2a4   : > { %5988 = vst [vmem:[%s10041_s25 + $0xd0] sm:$0xff] %v5924_v52  ;;  %v5862_v56 = vadd.f32 %v8259_v54, %v10034_v55  ;;  %v8181_v60 = vpop.f32.mrb[30].mxu0  ;;  %v2757_v2 = vpop.f32.mrb[31].mxu1 }
 0x2a5   : > { %v5927_v62 = vmax.f32 %v5863_v23, 0.0  ;;  %v8260_v0 = vadd.f32 %v8181_v60, %v7789_v37  ;;  %v5594_v4 = vpop.f32.mrb[31].mxu0 }
 0x2a6   : > { %v5926_v6 = vmax.f32 %v5862_v56, 0.0  ;;  %v8261_v12 = vadd.f32 %v5594_v4, %v2757_v2 }
 0x2a7   : > { %5991 = vst [vmem:[%s10041_s25 + $0xe8] sm:$0xff] %v5927_v62  ;;  %v5865_v8 = vadd.f32 %v8260_v0, %v10034_v55  ;;  %v7792_v19 = vpop.f32.mrb[32].mxu1 }
 0x2a8   : > { %5990 = vst [vmem:[%s10041_s25 + $0xe0] sm:$0xff] %v5926_v6  ;;  %v5864_v47 = vadd.f32 %v8261_v12, %v10034_v55  ;;  %v8184_v11 = vpop.f32.mrb[32].mxu0  ;;  %v2767_v31 = vpop.f32.mrb[33].mxu1 }
 0x2a9   : > { %v5929_v25 = vmax.f32 %v5865_v8, 0.0  ;;  %v8262_v27 = vadd.f32 %v8184_v11, %v7792_v19  ;;  %v5604_v35 = vpop.f32.mrb[33].mxu0 }
 0x2aa   : > { %v5928_v14 = vmax.f32 %v5864_v47, 0.0  ;;  %v8263_v39 = vadd.f32 %v5604_v35, %v2767_v31 }
 0x2ab   : > { %5993 = vst [vmem:[%s10041_s25 + $0xf8] sm:$0xff] %v5929_v25  ;;  %v5867_v16 = vadd.f32 %v8262_v27, %v10034_v55  ;;  %v7795_v49 = vpop.f32.mrb[34].mxu1 }
 0x2ac   : > { %5992 = vst [vmem:[%s10041_s25 + $0xf0] sm:$0xff] %v5928_v14  ;;  %v5866_v45 = vadd.f32 %v8263_v39, %v10034_v55  ;;  %v8187_v53 = vpop.f32.mrb[34].mxu0  ;;  %v2777_v63 = vpop.f32.mrb[35].mxu1 }
 0x2ad   : > { %v5931_v57 = vmax.f32 %v5867_v16, 0.0  ;;  %v8264_v59 = vadd.f32 %v8187_v53, %v7795_v49  ;;  %v5614_v17 = vpop.f32.mrb[35].mxu0 }
 0x2ae   : > { %v5930_v3 = vmax.f32 %v5866_v45, 0.0  ;;  %v8265_v18 = vadd.f32 %v5614_v17, %v2777_v63 }
 0x2af   : > { %5995 = vst [vmem:[%s10041_s25 + $0x108] sm:$0xff] %v5931_v57  ;;  %v5869_v13 = vadd.f32 %v8264_v59, %v10034_v55  ;;  %v7798_v26 = vpop.f32.mrb[36].mxu1 }
 0x2b0   : > { %5994 = vst [vmem:[%s10041_s25 + $0x100] sm:$0xff] %v5930_v3  ;;  %v5868_v21 = vadd.f32 %v8265_v18, %v10034_v55  ;;  %v8190_v33 = vpop.f32.mrb[36].mxu0  ;;  %v2787_v20 = vpop.f32.mrb[37].mxu1 }
 0x2b1   : > { %v5933_v41 = vmax.f32 %v5869_v13, 0.0  ;;  %v8266_v43 = vadd.f32 %v8190_v33, %v7798_v26  ;;  %v5624_v51 = vpop.f32.mrb[37].mxu0 }
 0x2b2   : > { %v5932_v1 = vmax.f32 %v5868_v21, 0.0  ;;  %v8267_v7 = vadd.f32 %v5624_v51, %v2787_v20 }
 0x2b3   : > { %5997 = vst [vmem:[%s10041_s25 + $0x118] sm:$0xff] %v5933_v41  ;;  %v5871_v15 = vadd.f32 %v8266_v43, %v10034_v55  ;;  %v7801_v42 = vpop.f32.mrb[38].mxu1 }
 0x2b4   : > { %5996 = vst [vmem:[%s10041_s25 + $0x110] sm:$0xff] %v5932_v1  ;;  %v5870_v29 = vadd.f32 %v8267_v7, %v10034_v55  ;;  %v8193_v10 = vpop.f32.mrb[38].mxu0  ;;  %v2797_v24 = vpop.f32.mrb[39].mxu1 }
 0x2b5   : > { %v5935_v22 = vmax.f32 %v5871_v15, 0.0  ;;  %v8268_v61 = vadd.f32 %v8193_v10, %v7801_v42  ;;  %v5634_v58 = vpop.f32.mrb[39].mxu0 }
 0x2b6   : > { %v5934_v28 = vmax.f32 %v5870_v29, 0.0  ;;  %v8269_v30 = vadd.f32 %v5634_v58, %v2797_v24 }
 0x2b7   : > { %5999 = vst [vmem:[%s10041_s25 + $0x128] sm:$0xff] %v5935_v22  ;;  %v5873_v32 = vadd.f32 %v8268_v61, %v10034_v55  ;;  %v7804_v36 = vpop.f32.mrb[40].mxu1 }
 0x2b8   : > { %5998 = vst [vmem:[%s10041_s25 + $0x120] sm:$0xff] %v5934_v28  ;;  %v5872_v34 = vadd.f32 %v8269_v30, %v10034_v55  ;;  %v8196_v38 = vpop.f32.mrb[40].mxu0  ;;  %v2807_v9 = vpop.f32.mrb[41].mxu1 }
 0x2b9   : > { %v5937_v5 = vmax.f32 %v5873_v32, 0.0  ;;  %v8270_v40 = vadd.f32 %v8196_v38, %v7804_v36  ;;  %v5644_v44 = vpop.f32.mrb[41].mxu0 }
 0x2ba   : > { %v5936_v46 = vmax.f32 %v5872_v34, 0.0  ;;  %v8271_v48 = vadd.f32 %v5644_v44, %v2807_v9 }
 0x2bb   : > { %6001 = vst [vmem:[%s10041_s25 + $0x138] sm:$0xff] %v5937_v5  ;;  %v5875_v50 = vadd.f32 %v8270_v40, %v10034_v55  ;;  %v7807_v54 = vpop.f32.mrb[42].mxu1 }
 0x2bc   : > { %6000 = vst [vmem:[%s10041_s25 + $0x130] sm:$0xff] %v5936_v46  ;;  %v5874_v52 = vadd.f32 %v8271_v48, %v10034_v55  ;;  %v8199_v23 = vpop.f32.mrb[42].mxu0  ;;  %v2817_v60 = vpop.f32.mrb[43].mxu1 }
 0x2bd   : > { %v5939_v56 = vmax.f32 %v5875_v50, 0.0  ;;  %v8272_v37 = vadd.f32 %v8199_v23, %v7807_v54  ;;  %v5654_v62 = vpop.f32.mrb[43].mxu0 }
 0x2be   : > { %v5938_v0 = vmax.f32 %v5874_v52, 0.0  ;;  %v8273_v2 = vadd.f32 %v5654_v62, %v2817_v60 }
 0x2bf   : > { %6003 = vst [vmem:[%s10041_s25 + $0x148] sm:$0xff] %v5939_v56  ;;  %v5877_v4 = vadd.f32 %v8272_v37, %v10034_v55  ;;  %v7810_v12 = vpop.f32.mrb[44].mxu1 }
 0x2c0   : > { %6002 = vst [vmem:[%s10041_s25 + $0x140] sm:$0xff] %v5938_v0  ;;  %v5876_v6 = vadd.f32 %v8273_v2, %v10034_v55  ;;  %v8202_v8 = vpop.f32.mrb[44].mxu0  ;;  %v2827_v11 = vpop.f32.mrb[45].mxu1 }
 0x2c1   : > { %v5941_v47 = vmax.f32 %v5877_v4, 0.0  ;;  %v8274_v19 = vadd.f32 %v8202_v8, %v7810_v12  ;;  %v5664_v25 = vpop.f32.mrb[45].mxu0 }
 0x2c2   : > { %v5940_v27 = vmax.f32 %v5876_v6, 0.0  ;;  %v8275_v31 = vadd.f32 %v5664_v25, %v2827_v11 }
 0x2c3   : > { %6005 = vst [vmem:[%s10041_s25 + $0x158] sm:$0xff] %v5941_v47  ;;  %v5879_v35 = vadd.f32 %v8274_v19, %v10034_v55  ;;  %v7813_v39 = vpop.f32.mrb[46].mxu1 }
 0x2c4   : > { %6004 = vst [vmem:[%s10041_s25 + $0x150] sm:$0xff] %v5940_v27  ;;  %v5878_v14 = vadd.f32 %v8275_v31, %v10034_v55  ;;  %v8205_v16 = vpop.f32.mrb[46].mxu0  ;;  %v2837_v53 = vpop.f32.mrb[47].mxu1 }
 0x2c5   : > { %v5943_v45 = vmax.f32 %v5879_v35, 0.0  ;;  %v8276_v49 = vadd.f32 %v8205_v16, %v7813_v39  ;;  %v5674_v57 = vpop.f32.mrb[47].mxu0 }
 0x2c6   : > { %v5942_v59 = vmax.f32 %v5878_v14, 0.0  ;;  %v8277_v63 = vadd.f32 %v5674_v57, %v2837_v53 }
 0x2c7   : > { %6007 = vst [vmem:[%s10041_s25 + $0x168] sm:$0xff] %v5943_v45  ;;  %v5881_v17 = vadd.f32 %v8276_v49, %v10034_v55  ;;  %v7816_v18 = vpop.f32.mrb[48].mxu1 }
 0x2c8   : > { %6006 = vst [vmem:[%s10041_s25 + $0x160] sm:$0xff] %v5942_v59  ;;  %v5880_v3 = vadd.f32 %v8277_v63, %v10034_v55  ;;  %v8208_v13 = vpop.f32.mrb[48].mxu0  ;;  %v2847_v33 = vpop.f32.mrb[49].mxu1 }
 0x2c9   : > { %v5945_v21 = vmax.f32 %v5881_v17, 0.0  ;;  %v8278_v26 = vadd.f32 %v8208_v13, %v7816_v18  ;;  %v5684_v41 = vpop.f32.mrb[49].mxu0 }
 0x2ca   : > { %v5944_v43 = vmax.f32 %v5880_v3, 0.0  ;;  %v8279_v20 = vadd.f32 %v5684_v41, %v2847_v33 }
 0x2cb   : > { %6009 = vst [vmem:[%s10041_s25 + $0x178] sm:$0xff] %v5945_v21  ;;  %v5883_v51 = vadd.f32 %v8278_v26, %v10034_v55  ;;  %v7819_v7 = vpop.f32.mrb[50].mxu1 }
 0x2cc   : > { %6008 = vst [vmem:[%s10041_s25 + $0x170] sm:$0xff] %v5944_v43  ;;  %v5882_v1 = vadd.f32 %v8279_v20, %v10034_v55  ;;  %v8211_v15 = vpop.f32.mrb[50].mxu0  ;;  %v2857_v10 = vpop.f32.mrb[51].mxu1 }
 0x2cd   : > { %v5947_v29 = vmax.f32 %v5883_v51, 0.0  ;;  %v8280_v42 = vadd.f32 %v8211_v15, %v7819_v7  ;;  %v5694_v22 = vpop.f32.mrb[51].mxu0 }
 0x2ce   : > { %v5946_v61 = vmax.f32 %v5882_v1, 0.0  ;;  %v8281_v24 = vadd.f32 %v5694_v22, %v2857_v10 }
 0x2cf   : > { %6011 = vst [vmem:[%s10041_s25 + $0x188] sm:$0xff] %v5947_v29  ;;  %v5885_v58 = vadd.f32 %v8280_v42, %v10034_v55  ;;  %v7822_v30 = vpop.f32.mrb[52].mxu1 }
 0x2d0   : > { %6010 = vst [vmem:[%s10041_s25 + $0x180] sm:$0xff] %v5946_v61  ;;  %v5884_v28 = vadd.f32 %v8281_v24, %v10034_v55  ;;  %v8214_v32 = vpop.f32.mrb[52].mxu0  ;;  %v2867_v38 = vpop.f32.mrb[53].mxu1 }
 0x2d1   : > { %v5949_v34 = vmax.f32 %v5885_v58, 0.0  ;;  %v8282_v36 = vadd.f32 %v8214_v32, %v7822_v30  ;;  %v5704_v5 = vpop.f32.mrb[53].mxu0 }
 0x2d2   : > { %v5948_v40 = vmax.f32 %v5884_v28, 0.0  ;;  %v8283_v9 = vadd.f32 %v5704_v5, %v2867_v38 }
 0x2d3   : > { %6013 = vst [vmem:[%s10041_s25 + $0x198] sm:$0xff] %v5949_v34  ;;  %v5887_v44 = vadd.f32 %v8282_v36, %v10034_v55  ;;  %v7825_v48 = vpop.f32.mrb[54].mxu1 }
 0x2d4   : > { %6012 = vst [vmem:[%s10041_s25 + $0x190] sm:$0xff] %v5948_v40  ;;  %v5886_v46 = vadd.f32 %v8283_v9, %v10034_v55  ;;  %v8217_v50 = vpop.f32.mrb[54].mxu0  ;;  %v2877_v23 = vpop.f32.mrb[55].mxu1 }
 0x2d5   : > { %v5951_v52 = vmax.f32 %v5887_v44, 0.0  ;;  %v8284_v54 = vadd.f32 %v8217_v50, %v7825_v48  ;;  %v5714_v56 = vpop.f32.mrb[55].mxu0 }
 0x2d6   : > { %v5950_v37 = vmax.f32 %v5886_v46, 0.0  ;;  %v8285_v60 = vadd.f32 %v5714_v56, %v2877_v23 }
 0x2d7   : > { %6015 = vst [vmem:[%s10041_s25 + $0x1a8] sm:$0xff] %v5951_v52  ;;  %v5889_v62 = vadd.f32 %v8284_v54, %v10034_v55  ;;  %v7828_v2 = vpop.f32.mrb[56].mxu1 }
 0x2d8   : > { %6014 = vst [vmem:[%s10041_s25 + $0x1a0] sm:$0xff] %v5950_v37  ;;  %v5888_v0 = vadd.f32 %v8285_v60, %v10034_v55  ;;  %v8220_v4 = vpop.f32.mrb[56].mxu0  ;;  %v2887_v8 = vpop.f32.mrb[57].mxu1 }
 0x2d9   : > { %v5953_v6 = vmax.f32 %v5889_v62, 0.0  ;;  %v8286_v12 = vadd.f32 %v8220_v4, %v7828_v2  ;;  %v5724_v47 = vpop.f32.mrb[57].mxu0 }
 0x2da   : > { %v5952_v19 = vmax.f32 %v5888_v0, 0.0  ;;  %v8287_v11 = vadd.f32 %v5724_v47, %v2887_v8 }
 0x2db   : > { %6017 = vst [vmem:[%s10041_s25 + $0x1b8] sm:$0xff] %v5953_v6  ;;  %v5891_v25 = vadd.f32 %v8286_v12, %v10034_v55  ;;  %v7831_v31 = vpop.f32.mrb[58].mxu1 }
 0x2dc   : > { %6016 = vst [vmem:[%s10041_s25 + $0x1b0] sm:$0xff] %v5952_v19  ;;  %v5890_v27 = vadd.f32 %v8287_v11, %v10034_v55  ;;  %v8223_v35 = vpop.f32.mrb[58].mxu0  ;;  %v2897_v16 = vpop.f32.mrb[59].mxu1 }
 0x2dd   : > { %v5955_v14 = vmax.f32 %v5891_v25, 0.0  ;;  %v8288_v39 = vadd.f32 %v8223_v35, %v7831_v31  ;;  %v5734_v45 = vpop.f32.mrb[59].mxu0 }
 0x2de   : > { %v5954_v49 = vmax.f32 %v5890_v27, 0.0  ;;  %v8289_v53 = vadd.f32 %v5734_v45, %v2897_v16 }
 0x2df   : > { %6019 = vst [vmem:[%s10041_s25 + $0x1c8] sm:$0xff] %v5955_v14  ;;  %v5893_v57 = vadd.f32 %v8288_v39, %v10034_v55  ;;  %v7834_v63 = vpop.f32.mrb[60].mxu1 }
 0x2e0   : > { %6018 = vst [vmem:[%s10041_s25 + $0x1c0] sm:$0xff] %v5954_v49  ;;  %v5892_v59 = vadd.f32 %v8289_v53, %v10034_v55  ;;  %v8226_v17 = vpop.f32.mrb[60].mxu0  ;;  %v2907_v13 = vpop.f32.mrb[61].mxu1 }
 0x2e1   : > { %v5957_v3 = vmax.f32 %v5893_v57, 0.0  ;;  %v8290_v18 = vadd.f32 %v8226_v17, %v7834_v63  ;;  %v5744_v21 = vpop.f32.mrb[61].mxu0 }
 0x2e2   : > { %v5956_v26 = vmax.f32 %v5892_v59, 0.0  ;;  %v8291_v33 = vadd.f32 %v5744_v21, %v2907_v13 }
 0x2e3   : > { %6021 = vst [vmem:[%s10041_s25 + $0x1d8] sm:$0xff] %v5957_v3  ;;  %v5895_v41 = vadd.f32 %v8290_v18, %v10034_v55  ;;  %v7837_v20 = vpop.f32.mrb[62].mxu1 }
 0x2e4   : > { %6020 = vst [vmem:[%s10041_s25 + $0x1d0] sm:$0xff] %v5956_v26  ;;  %v5894_v43 = vadd.f32 %v8291_v33, %v10034_v55  ;;  %v8229_v51 = vpop.f32.mrb[62].mxu0  ;;  %v2917_v15 = vpop.f32.mrb[63].mxu1 }
 0x2e5   : > { %v5959_v1 = vmax.f32 %v5895_v41, 0.0  ;;  %v8292_v7 = vadd.f32 %v8229_v51, %v7837_v20  ;;  %v5754_v29 = vpop.f32.mrb[63].mxu0 }
 0x2e6   : > { %v5958_v42 = vmax.f32 %v5894_v43, 0.0  ;;  %v8293_v10 = vadd.f32 %v5754_v29, %v2917_v15 }
 0x2e7   : > { %6023 = vst [vmem:[%s10041_s25 + $0x1e8] sm:$0xff] %v5959_v1  ;;  %v5897_v22 = vadd.f32 %v8292_v7, %v10034_v55 }
 0x2e8   : > { %6022 = vst [vmem:[%s10041_s25 + $0x1e0] sm:$0xff] %v5958_v42  ;;  %v5896_v61 = vadd.f32 %v8293_v10, %v10034_v55 }
 0x2e9   : > { %v5961_v24 = vmax.f32 %v5897_v22, 0.0 }
 0x2ea   : > { %v5960_v58 = vmax.f32 %v5896_v61, 0.0 }
 0x2eb   : > { %6025 = vst [vmem:[%s10041_s25 + $0x1f8] sm:$0xff] %v5961_v24 }
 0x2ec   : > { %6024 = vst [vmem:[%s10041_s25 + $0x1f0] sm:$0xff] %v5960_v58 }
 0x2ed PF: > { %s14_s17 = sadd.s32 1, %s8725_s17   ;;  %s10184_s15 = smov %s8721_s16 }
 0x2ee   : > { %p11_p5 = scmp.ge.s32.totalorder %s14_s17, 4   ;;  %s10185_s16 = smov %s10187_s18 }
 0x2f0   :  { %13 = sbr.rel (!%p11_p5) target bundleno = 2 (0x2), region = 71 }

</bundles_post_ra>
